<compile_context>
chip_gen: v5e
topology: v5e:2x2
jax: 0.10.0
libtpu: 0.0.40
codegen_flags: <defaults>
</compile_context>

<pallas_src>
import functools

import jax
import jax.numpy as jnp
from jax.experimental import pallas as pl
from jax.experimental.pallas import tpu as pltpu

_LANES = 128          # lane width of the padded MLP head / output slab
_NEG_INF = -1e30      # bias fill that zeroes padded logit lanes after softmax


def _round_up(x, m):
    return (x + m - 1) // m * m


def _net_kernel(num_layers, hidden_size, b_pad, seq_len, x_ref, *refs):
    """Whole forward pass in one (gridless) kernel; all operands fit in VMEM.

    x_ref: (T*B_pad, D_in) time-major flattened input (row index = t*B_pad + b).
    refs layout:
      [w_ih_t, w_hh_t, b] * num_layers   # pre-transposed (D_l,4H)/(H,4H); b (1,4H) f32
      w1_t, b1, w2_t, b2, w3_t, b3       # lane-padded to 128 output columns
      out_ref                            # (T*B_pad, 128) lane-dense output slab
      h_scratch                          # VMEM (T*B_pad, H) hidden-state buffer
      xproj_ref                          # VMEM (T*B_pad, 4H) hoisted input projection
    """
    n_lstm = 3 * num_layers
    lstm_refs = refs[:n_lstm]
    w1_ref, b1_ref, w2_ref, b2_ref, w3_ref, b3_ref = refs[n_lstm:n_lstm + 6]
    out_ref = refs[n_lstm + 6]
    h_scratch = refs[n_lstm + 7]
    xproj_ref = refs[n_lstm + 8]

    B, T, H = b_pad, seq_len, hidden_size

    # ---------------- multi-layer LSTM (h0 = c0 = 0) -------------------------
    for layer in range(num_layers):
        w_ih_t = lstm_refs[3 * layer][...]       # (D_l, 4H), pre-transposed
        w_hh_t = lstm_refs[3 * layer + 1][...]   # (H,   4H), pre-transposed
        b = lstm_refs[3 * layer + 2][...]        # (1,   4H), b_ih + b_hh (f32)
        cdt = w_ih_t.dtype                       # matmul operand dtype (f32/bf16)

        layer_in = x_ref[...] if layer == 0 else h_scratch[...]   # (T*B, D_l)

        # Hoisted input projection + bias, written to an explicit VMEM scratch
        # so its live range is bounded and per-step slices stream from the ref.
        xproj_ref[...] = jnp.dot(layer_in.astype(cdt), w_ih_t,
                                 preferred_element_type=jnp.float32) + b

        def step(t, carry, w_hh_t=w_hh_t, cdt=cdt):
            h, c = carry
            idx = pl.multiple_of(t * B, B)                     # full-tile offset
            gates = xproj_ref[pl.ds(idx, B), :] + jnp.dot(
                h.astype(cdt), w_hh_t, preferred_element_type=jnp.float32)
            # PyTorch gate order: i, f, g, o.  One full-width sigmoid push for
            # i/f/o; tanh only on the g slice (avoid wasted EUP work).
            sig = jax.nn.sigmoid(gates)                        # (B, 4H), f32
            i_g = sig[:, 0 * H:1 * H]
            f_g = sig[:, 1 * H:2 * H]
            o_g = sig[:, 3 * H:4 * H]
            g_g = jnp.tanh(gates[:, 2 * H:3 * H])
            c_new = f_g * c + i_g * g_g
            h_new = o_g * jnp.tanh(c_new)
            h_scratch[pl.ds(idx, B), :] = h_new                # contiguous block
            return h_new, c_new

        h0 = jnp.zeros((B, H), jnp.float32)
        c0 = jnp.zeros((B, H), jnp.float32)
        jax.lax.fori_loop(0, T, step, (h0, c0), unroll=True)

    # ---------------- MLP head (lane-padded to 128) + softmax ----------------
    feat = h_scratch[...]                                       # (T*B, H) f32
    cdt = w1_ref.dtype
    h1 = jnp.dot(feat.astype(cdt), w1_ref[...],
                 preferred_element_type=jnp.float32) + b1_ref[...]
    h1 = jnp.maximum(h1, 0.0)
    # dropout(p=0.1) in eval mode -> identity
    h2 = jnp.dot(h1.astype(cdt), w2_ref[...],
                 preferred_element_type=jnp.float32) + b2_ref[...]
    h2 = jnp.maximum(h2, 0.0)
    # dropout(p=0.1) in eval mode -> identity
    logits = jnp.dot(h2.astype(cdt), w3_ref[...],
                     preferred_element_type=jnp.float32) + b3_ref[...]
    # Padded logit lanes carry a -1e30 bias -> exp underflows to exactly 0.
    m = jnp.max(logits, axis=-1, keepdims=True)
    e = jnp.exp(logits - m)
    inv = pl.reciprocal(jnp.sum(e, axis=-1, keepdims=True), approx=True)
    out_ref[...] = e * inv                                      # lane-dense store


def net_forward(x, params, *, hidden_size, num_layers, matmul_dtype=jnp.float32):
    """matmul_dtype=jnp.bfloat16 selects the native MXU path on v6e/v7x;
    elementwise math stays f32 in either case (v5e-safe)."""
    B, T, D = x.shape
    H = hidden_size
    B_pad = _round_up(B, 8)          # full f32 sublane tile per timestep block

    # Time-major flattened layout (row = t*B_pad + b), batch zero-padded so
    # every per-timestep block is an unmasked (8, lanes) tile.
    x_tm = jnp.transpose(x, (1, 0, 2))                           # (T, B, D)
    x_tm = jnp.pad(x_tm, ((0, 0), (0, B_pad - B), (0, 0)))       # (T, B_pad, D)
    x_flat = x_tm.reshape(T * B_pad, D)

    flat = []
    for layer in range(num_layers):
        w_ih, w_hh, b_ih, b_hh = params["lstm"][layer]
        flat += [w_ih.T.astype(matmul_dtype),                    # (D_l, 4H)
                 w_hh.T.astype(matmul_dtype),                    # (H,   4H)
                 (b_ih + b_hh).reshape(1, -1).astype(jnp.float32)]

    output_size = params["fc3"][0].shape[0]

    def pad_linear(name, in_width, bias_fill=0.0):
        w, b = params[name]                     # w: (out, in), b: (out,)
        o, i = w.shape
        wt = jnp.zeros((in_width, _LANES), jnp.float32).at[:i, :o].set(w.T)
        bp = jnp.full((1, _LANES), bias_fill, jnp.float32).at[0, :o].set(b)
        return wt.astype(matmul_dtype), bp

    w1t, b1p = pad_linear("fc1", H)
    w2t, b2p = pad_linear("fc2", _LANES)
    w3t, b3p = pad_linear("fc3", _LANES, bias_fill=_NEG_INF)
    flat += [w1t, b1p, w2t, b2p, w3t, b3p]

    kernel = functools.partial(_net_kernel, num_layers, H, B_pad, T)
    out_flat = pl.pallas_call(
        kernel,
        out_shape=jax.ShapeDtypeStruct((T * B_pad, _LANES), jnp.float32),
        in_specs=[pl.BlockSpec(memory_space=pltpu.MemorySpace.VMEM)] * (1 + len(flat)),
        out_specs=pl.BlockSpec(memory_space=pltpu.MemorySpace.VMEM),
        scratch_shapes=[pltpu.VMEM((T * B_pad, H), jnp.float32),        # h_scratch
                        pltpu.VMEM((T * B_pad, 4 * H), jnp.float32)],   # x_proj
    )(x_flat, *flat)

    # Wrapper-side layout plumbing: drop padded rows/lanes, back to (B, T, O).
    out = out_flat.reshape(T, B_pad, _LANES)[:, :B, :output_size]
    return out.transpose(1, 0, 2)


def init_params(key, input_size, hidden_size, num_layers, output_size):
    """Deterministic uniform(-1/sqrt(H), 1/sqrt(H)) init (PyTorch-style shapes)."""
    bound = 1.0 / jnp.sqrt(hidden_size)

    def u(k, shape):
        return jax.random.uniform(k, shape, jnp.float32, -bound, bound)

    params = {"lstm": []}
    for layer in range(num_layers):
        d_in = input_size if layer == 0 else hidden_size
        key, k1, k2, k3, k4 = jax.random.split(key, 5)
        params["lstm"].append((
            u(k1, (4 * hidden_size, d_in)),         # weight_ih_l{layer}
            u(k2, (4 * hidden_size, hidden_size)),  # weight_hh_l{layer}
            u(k3, (4 * hidden_size,)),              # bias_ih_l{layer}
            u(k4, (4 * hidden_size,)),              # bias_hh_l{layer}
        ))
    dims = [(hidden_size // 2, hidden_size),
            (hidden_size // 4, hidden_size // 2),
            (output_size, hidden_size // 4)]
    for name, (o, i) in zip(("fc1", "fc2", "fc3"), dims):
        key, kw, kb = jax.random.split(key, 3)
        params[name] = (u(kw, (o, i)), u(kb, (o,)))
    return params


def net_forward_ref(x, params, *, hidden_size, num_layers):
    """Pure-JAX reference (same math) for a correctness check."""
    B, T, _ = x.shape
    H = hidden_size
    layer_in = x
    for layer in range(num_layers):
        w_ih, w_hh, b_ih, b_hh = params["lstm"][layer]
        h = jnp.zeros((B, H), jnp.float32)
        c = jnp.zeros((B, H), jnp.float32)
        outs = []
        for t in range(T):
            gates = layer_in[:, t, :] @ w_ih.T + h @ w_hh.T + b_ih + b_hh
            i, f, g, o = (jax.nn.sigmoid(gates[:, :H]),
                          jax.nn.sigmoid(gates[:, H:2 * H]),
                          jnp.tanh(gates[:, 2 * H:3 * H]),
                          jax.nn.sigmoid(gates[:, 3 * H:]))
            c = f * c + i * g
            h = o * jnp.tanh(c)
            outs.append(h)
        layer_in = jnp.stack(outs, axis=1)
    out = layer_in
    out = jax.nn.relu(out @ params["fc1"][0].T + params["fc1"][1])
    out = jax.nn.relu(out @ params["fc2"][0].T + params["fc2"][1])
    out = out @ params["fc3"][0].T + params["fc3"][1]
    return jax.nn.softmax(out, axis=2)


if __name__ == "__main__":
    INPUT_SIZE = 16
    HIDDEN_SIZE = 32
    NUM_LAYERS = 2
    OUTPUT_SIZE = 8
    B, T = 2, 8

    key = jax.random.PRNGKey(0)
    key, xk = jax.random.split(key)
    x = jax.random.normal(xk, (B, T, INPUT_SIZE), jnp.float32)
    params = init_params(key, INPUT_SIZE, HIDDEN_SIZE, NUM_LAYERS, OUTPUT_SIZE)

    ref = net_forward_ref(x, params, hidden_size=HIDDEN_SIZE, num_layers=NUM_LAYERS)

    # f32 matmul path (matches the PyTorch module's default dtype).
    out = net_forward(x, params, hidden_size=HIDDEN_SIZE, num_layers=NUM_LAYERS)
    out = jax.block_until_ready(out)
    assert out.shape == (B, T, OUTPUT_SIZE)
    # Tolerance covers the approx-reciprocal softmax denominator.
    assert jnp.allclose(out, ref, atol=1e-3, rtol=1e-3), "f32 mismatch vs reference"

    # bf16 matmul-operand path (native MXU path on v6e/v7x; elementwise stays f32).
    out_bf16 = net_forward(x, params, hidden_size=HIDDEN_SIZE,
                           num_layers=NUM_LAYERS, matmul_dtype=jnp.bfloat16)
    out_bf16 = jax.block_until_ready(out_bf16)
    assert out_bf16.shape == (B, T, OUTPUT_SIZE)
    assert jnp.allclose(out_bf16, ref, atol=2e-2, rtol=2e-2), "bf16 mismatch vs reference"

    print("KERNEL_OK")
</pallas_src>

<mosaic_0001>
module attributes {stable_mosaic.version = 11 : i64} {
  func.func @_net_kernel(%arg0: memref<64x16xf32, #tpu.memory_space<vmem>>, %arg1: memref<16x128xf32, #tpu.memory_space<vmem>>, %arg2: memref<32x128xf32, #tpu.memory_space<vmem>>, %arg3: memref<1x128xf32, #tpu.memory_space<vmem>>, %arg4: memref<32x128xf32, #tpu.memory_space<vmem>>, %arg5: memref<32x128xf32, #tpu.memory_space<vmem>>, %arg6: memref<1x128xf32, #tpu.memory_space<vmem>>, %arg7: memref<32x128xf32, #tpu.memory_space<vmem>>, %arg8: memref<1x128xf32, #tpu.memory_space<vmem>>, %arg9: memref<128x128xf32, #tpu.memory_space<vmem>>, %arg10: memref<1x128xf32, #tpu.memory_space<vmem>>, %arg11: memref<128x128xf32, #tpu.memory_space<vmem>>, %arg12: memref<1x128xf32, #tpu.memory_space<vmem>>, %arg13: memref<64x128xf32, #tpu.memory_space<vmem>>, %arg14: memref<64x32xf32, #tpu.memory_space<vmem>>, %arg15: memref<64x128xf32, #tpu.memory_space<vmem>>) attributes {dimension_semantics = [], scalar_prefetch = 0 : i64, scratch_operands = 2 : i64, tpu.core_type = #tpu.core_type<tc>} {
    %c0 = arith.constant 0 : index
    %c0_0 = arith.constant 0 : index
    %0 = vector.load %arg1[%c0, %c0_0] : memref<16x128xf32, #tpu.memory_space<vmem>>, vector<16x128xf32>
    %c0_1 = arith.constant 0 : index
    %c0_2 = arith.constant 0 : index
    %1 = vector.load %arg2[%c0_1, %c0_2] : memref<32x128xf32, #tpu.memory_space<vmem>>, vector<32x128xf32>
    %c0_3 = arith.constant 0 : index
    %c0_4 = arith.constant 0 : index
    %2 = vector.load %arg3[%c0_3, %c0_4] : memref<1x128xf32, #tpu.memory_space<vmem>>, vector<1x128xf32>
    %c0_5 = arith.constant 0 : index
    %c0_6 = arith.constant 0 : index
    %3 = vector.load %arg0[%c0_5, %c0_6] : memref<64x16xf32, #tpu.memory_space<vmem>>, vector<64x16xf32>
    %cst = arith.constant dense<0.000000e+00> : vector<64x128xf32>
    %4 = tpu.matmul %3, %0, %cst {dimension_numbers = #tpu.dot_dimension_numbers<[1], [0], [0], [1], [0, 0, 1, 1], [], []>} : vector<64x16xf32>, vector<16x128xf32>, vector<64x128xf32> -> vector<64x128xf32>
    %5 = vector.broadcast %2 : vector<1x128xf32> to vector<64x128xf32>
    %6 = arith.addf %4, %5 : vector<64x128xf32>
    %c0_7 = arith.constant 0 : index
    %c0_8 = arith.constant 0 : index
    %7 = vector.load %arg15[%c0_7, %c0_8] : memref<64x128xf32, #tpu.memory_space<vmem>>, vector<64x128xf32>
    tpu.vector_store %arg15[%c0_7, %c0_8], %6 {strides = array<i32>} : memref<64x128xf32, #tpu.memory_space<vmem>>, vector<64x128xf32>,
    %cst_9 = arith.constant 0.000000e+00 : f32
    %8 = vector.broadcast %cst_9 : f32 to vector<8x32xf32>
    %cst_10 = arith.constant 0.000000e+00 : f32
    %9 = vector.broadcast %cst_10 : f32 to vector<8x32xf32>
    %c0_i32 = arith.constant 0 : i32
    %c8_i32 = arith.constant 8 : i32
    %10 = arith.muli %c0_i32, %c8_i32 : i32
    %11 = tpu.assume_multiple %10, 8 : i32
    %12 = arith.index_cast %11 : i32 to index
    %c0_11 = arith.constant 0 : index
    %13 = vector.load %arg15[%12, %c0_11] : memref<64x128xf32, #tpu.memory_space<vmem>>, vector<8x128xf32>
    %cst_12 = arith.constant dense<0.000000e+00> : vector<8x128xf32>
    %14 = tpu.matmul %8, %1, %cst_12 {dimension_numbers = #tpu.dot_dimension_numbers<[1], [0], [0], [1], [0, 0, 1, 1], [], []>} : vector<8x32xf32>, vector<32x128xf32>, vector<8x128xf32> -> vector<8x128xf32>
    %15 = arith.addf %13, %14 : vector<8x128xf32>
    %16 = arith.negf %15 : vector<8x128xf32>
    %17 = math.exp %16 : vector<8x128xf32>
    %cst_13 = arith.constant 1.000000e+00 : f32
    %18 = vector.broadcast %cst_13 : f32 to vector<8x128xf32>
    %19 = arith.addf %18, %17 : vector<8x128xf32>
    %20 = arith.divf %18, %19 : vector<8x128xf32>
    %21 = vector.extract_strided_slice %20 {offsets = [0, 0], sizes = [8, 32], strides = [1, 1]} : vector<8x128xf32> to vector<8x32xf32>
    %22 = vector.extract_strided_slice %20 {offsets = [0, 32], sizes = [8, 32], strides = [1, 1]} : vector<8x128xf32> to vector<8x32xf32>
    %23 = vector.extract_strided_slice %20 {offsets = [0, 96], sizes = [8, 32], strides = [1, 1]} : vector<8x128xf32> to vector<8x32xf32>
    %24 = vector.extract_strided_slice %15 {offsets = [0, 64], sizes = [8, 32], strides = [1, 1]} : vector<8x128xf32> to vector<8x32xf32>
    %25 = math.tanh %24 : vector<8x32xf32>
    %26 = arith.mulf %22, %9 : vector<8x32xf32>
    %27 = arith.mulf %21, %25 : vector<8x32xf32>
    %28 = arith.addf %26, %27 : vector<8x32xf32>
    %29 = math.tanh %28 : vector<8x32xf32>
    %30 = arith.mulf %23, %29 : vector<8x32xf32>
    %31 = arith.index_cast %11 : i32 to index
    %c0_14 = arith.constant 0 : index
    %32 = vector.load %arg14[%31, %c0_14] : memref<64x32xf32, #tpu.memory_space<vmem>>, vector<8x32xf32>
    tpu.vector_store %arg14[%31, %c0_14], %30 {strides = array<i32>} : memref<64x32xf32, #tpu.memory_space<vmem>>, vector<8x32xf32>,
    %c1_i32 = arith.constant 1 : i32
    %c8_i32_15 = arith.constant 8 : i32
    %33 = arith.muli %c1_i32, %c8_i32_15 : i32
    %34 = tpu.assume_multiple %33, 8 : i32
    %35 = arith.index_cast %34 : i32 to index
    %c0_16 = arith.constant 0 : index
    %36 = vector.load %arg15[%35, %c0_16] : memref<64x128xf32, #tpu.memory_space<vmem>>, vector<8x128xf32>
    %cst_17 = arith.constant dense<0.000000e+00> : vector<8x128xf32>
    %37 = tpu.matmul %30, %1, %cst_17 {dimension_numbers = #tpu.dot_dimension_numbers<[1], [0], [0], [1], [0, 0, 1, 1], [], []>} : vector<8x32xf32>, vector<32x128xf32>, vector<8x128xf32> -> vector<8x128xf32>
    %38 = arith.addf %36, %37 : vector<8x128xf32>
    %39 = arith.negf %38 : vector<8x128xf32>
    %40 = math.exp %39 : vector<8x128xf32>
    %cst_18 = arith.constant 1.000000e+00 : f32
    %41 = vector.broadcast %cst_18 : f32 to vector<8x128xf32>
    %42 = arith.addf %41, %40 : vector<8x128xf32>
    %43 = arith.divf %41, %42 : vector<8x128xf32>
    %44 = vector.extract_strided_slice %43 {offsets = [0, 0], sizes = [8, 32], strides = [1, 1]} : vector<8x128xf32> to vector<8x32xf32>
    %45 = vector.extract_strided_slice %43 {offsets = [0, 32], sizes = [8, 32], strides = [1, 1]} : vector<8x128xf32> to vector<8x32xf32>
    %46 = vector.extract_strided_slice %43 {offsets = [0, 96], sizes = [8, 32], strides = [1, 1]} : vector<8x128xf32> to vector<8x32xf32>
    %47 = vector.extract_strided_slice %38 {offsets = [0, 64], sizes = [8, 32], strides = [1, 1]} : vector<8x128xf32> to vector<8x32xf32>
    %48 = math.tanh %47 : vector<8x32xf32>
    %49 = arith.mulf %45, %28 : vector<8x32xf32>
    %50 = arith.mulf %44, %48 : vector<8x32xf32>
    %51 = arith.addf %49, %50 : vector<8x32xf32>
    %52 = math.tanh %51 : vector<8x32xf32>
    %53 = arith.mulf %46, %52 : vector<8x32xf32>
    %54 = arith.index_cast %34 : i32 to index
    %c0_19 = arith.constant 0 : index
    %55 = vector.load %arg14[%54, %c0_19] : memref<64x32xf32, #tpu.memory_space<vmem>>, vector<8x32xf32>
    tpu.vector_store %arg14[%54, %c0_19], %53 {strides = array<i32>} : memref<64x32xf32, #tpu.memory_space<vmem>>, vector<8x32xf32>,
    %c2_i32 = arith.constant 2 : i32
    %c8_i32_20 = arith.constant 8 : i32
    %56 = arith.muli %c2_i32, %c8_i32_20 : i32
    %57 = tpu.assume_multiple %56, 8 : i32
    %58 = arith.index_cast %57 : i32 to index
    %c0_21 = arith.constant 0 : index
    %59 = vector.load %arg15[%58, %c0_21] : memref<64x128xf32, #tpu.memory_space<vmem>>, vector<8x128xf32>
    %cst_22 = arith.constant dense<0.000000e+00> : vector<8x128xf32>
    %60 = tpu.matmul %53, %1, %cst_22 {dimension_numbers = #tpu.dot_dimension_numbers<[1], [0], [0], [1], [0, 0, 1, 1], [], []>} : vector<8x32xf32>, vector<32x128xf32>, vector<8x128xf32> -> vector<8x128xf32>
    %61 = arith.addf %59, %60 : vector<8x128xf32>
    %62 = arith.negf %61 : vector<8x128xf32>
    %63 = math.exp %62 : vector<8x128xf32>
    %cst_23 = arith.constant 1.000000e+00 : f32
    %64 = vector.broadcast %cst_23 : f32 to vector<8x128xf32>
    %65 = arith.addf %64, %63 : vector<8x128xf32>
    %66 = arith.divf %64, %65 : vector<8x128xf32>
    %67 = vector.extract_strided_slice %66 {offsets = [0, 0], sizes = [8, 32], strides = [1, 1]} : vector<8x128xf32> to vector<8x32xf32>
    %68 = vector.extract_strided_slice %66 {offsets = [0, 32], sizes = [8, 32], strides = [1, 1]} : vector<8x128xf32> to vector<8x32xf32>
    %69 = vector.extract_strided_slice %66 {offsets = [0, 96], sizes = [8, 32], strides = [1, 1]} : vector<8x128xf32> to vector<8x32xf32>
    %70 = vector.extract_strided_slice %61 {offsets = [0, 64], sizes = [8, 32], strides = [1, 1]} : vector<8x128xf32> to vector<8x32xf32>
    %71 = math.tanh %70 : vector<8x32xf32>
    %72 = arith.mulf %68, %51 : vector<8x32xf32>
    %73 = arith.mulf %67, %71 : vector<8x32xf32>
    %74 = arith.addf %72, %73 : vector<8x32xf32>
    %75 = math.tanh %74 : vector<8x32xf32>
    %76 = arith.mulf %69, %75 : vector<8x32xf32>
    %77 = arith.index_cast %57 : i32 to index
    %c0_24 = arith.constant 0 : index
    %78 = vector.load %arg14[%77, %c0_24] : memref<64x32xf32, #tpu.memory_space<vmem>>, vector<8x32xf32>
    tpu.vector_store %arg14[%77, %c0_24], %76 {strides = array<i32>} : memref<64x32xf32, #tpu.memory_space<vmem>>, vector<8x32xf32>,
    %c3_i32 = arith.constant 3 : i32
    %c8_i32_25 = arith.constant 8 : i32
    %79 = arith.muli %c3_i32, %c8_i32_25 : i32
    %80 = tpu.assume_multiple %79, 8 : i32
    %81 = arith.index_cast %80 : i32 to index
    %c0_26 = arith.constant 0 : index
    %82 = vector.load %arg15[%81, %c0_26] : memref<64x128xf32, #tpu.memory_space<vmem>>, vector<8x128xf32>
    %cst_27 = arith.constant dense<0.000000e+00> : vector<8x128xf32>
    %83 = tpu.matmul %76, %1, %cst_27 {dimension_numbers = #tpu.dot_dimension_numbers<[1], [0], [0], [1], [0, 0, 1, 1], [], []>} : vector<8x32xf32>, vector<32x128xf32>, vector<8x128xf32> -> vector<8x128xf32>
    %84 = arith.addf %82, %83 : vector<8x128xf32>
    %85 = arith.negf %84 : vector<8x128xf32>
    %86 = math.exp %85 : vector<8x128xf32>
    %cst_28 = arith.constant 1.000000e+00 : f32
    %87 = vector.broadcast %cst_28 : f32 to vector<8x128xf32>
    %88 = arith.addf %87, %86 : vector<8x128xf32>
    %89 = arith.divf %87, %88 : vector<8x128xf32>
    %90 = vector.extract_strided_slice %89 {offsets = [0, 0], sizes = [8, 32], strides = [1, 1]} : vector<8x128xf32> to vector<8x32xf32>
    %91 = vector.extract_strided_slice %89 {offsets = [0, 32], sizes = [8, 32], strides = [1, 1]} : vector<8x128xf32> to vector<8x32xf32>
    %92 = vector.extract_strided_slice %89 {offsets = [0, 96], sizes = [8, 32], strides = [1, 1]} : vector<8x128xf32> to vector<8x32xf32>
    %93 = vector.extract_strided_slice %84 {offsets = [0, 64], sizes = [8, 32], strides = [1, 1]} : vector<8x128xf32> to vector<8x32xf32>
    %94 = math.tanh %93 : vector<8x32xf32>
    %95 = arith.mulf %91, %74 : vector<8x32xf32>
    %96 = arith.mulf %90, %94 : vector<8x32xf32>
    %97 = arith.addf %95, %96 : vector<8x32xf32>
    %98 = math.tanh %97 : vector<8x32xf32>
    %99 = arith.mulf %92, %98 : vector<8x32xf32>
    %100 = arith.index_cast %80 : i32 to index
    %c0_29 = arith.constant 0 : index
    %101 = vector.load %arg14[%100, %c0_29] : memref<64x32xf32, #tpu.memory_space<vmem>>, vector<8x32xf32>
    tpu.vector_store %arg14[%100, %c0_29], %99 {strides = array<i32>} : memref<64x32xf32, #tpu.memory_space<vmem>>, vector<8x32xf32>,
    %c4_i32 = arith.constant 4 : i32
    %c8_i32_30 = arith.constant 8 : i32
    %102 = arith.muli %c4_i32, %c8_i32_30 : i32
    %103 = tpu.assume_multiple %102, 8 : i32
    %104 = arith.index_cast %103 : i32 to index
    %c0_31 = arith.constant 0 : index
    %105 = vector.load %arg15[%104, %c0_31] : memref<64x128xf32, #tpu.memory_space<vmem>>, vector<8x128xf32>
    %cst_32 = arith.constant dense<0.000000e+00> : vector<8x128xf32>
    %106 = tpu.matmul %99, %1, %cst_32 {dimension_numbers = #tpu.dot_dimension_numbers<[1], [0], [0], [1], [0, 0, 1, 1], [], []>} : vector<8x32xf32>, vector<32x128xf32>, vector<8x128xf32> -> vector<8x128xf32>
    %107 = arith.addf %105, %106 : vector<8x128xf32>
    %108 = arith.negf %107 : vector<8x128xf32>
    %109 = math.exp %108 : vector<8x128xf32>
    %cst_33 = arith.constant 1.000000e+00 : f32
    %110 = vector.broadcast %cst_33 : f32 to vector<8x128xf32>
    %111 = arith.addf %110, %109 : vector<8x128xf32>
    %112 = arith.divf %110, %111 : vector<8x128xf32>
    %113 = vector.extract_strided_slice %112 {offsets = [0, 0], sizes = [8, 32], strides = [1, 1]} : vector<8x128xf32> to vector<8x32xf32>
    %114 = vector.extract_strided_slice %112 {offsets = [0, 32], sizes = [8, 32], strides = [1, 1]} : vector<8x128xf32> to vector<8x32xf32>
    %115 = vector.extract_strided_slice %112 {offsets = [0, 96], sizes = [8, 32], strides = [1, 1]} : vector<8x128xf32> to vector<8x32xf32>
    %116 = vector.extract_strided_slice %107 {offsets = [0, 64], sizes = [8, 32], strides = [1, 1]} : vector<8x128xf32> to vector<8x32xf32>
    %117 = math.tanh %116 : vector<8x32xf32>
    %118 = arith.mulf %114, %97 : vector<8x32xf32>
    %119 = arith.mulf %113, %117 : vector<8x32xf32>
    %120 = arith.addf %118, %119 : vector<8x32xf32>
    %121 = math.tanh %120 : vector<8x32xf32>
    %122 = arith.mulf %115, %121 : vector<8x32xf32>
    %123 = arith.index_cast %103 : i32 to index
    %c0_34 = arith.constant 0 : index
    %124 = vector.load %arg14[%123, %c0_34] : memref<64x32xf32, #tpu.memory_space<vmem>>, vector<8x32xf32>
    tpu.vector_store %arg14[%123, %c0_34], %122 {strides = array<i32>} : memref<64x32xf32, #tpu.memory_space<vmem>>, vector<8x32xf32>,
    %c5_i32 = arith.constant 5 : i32
    %c8_i32_35 = arith.constant 8 : i32
    %125 = arith.muli %c5_i32, %c8_i32_35 : i32
    %126 = tpu.assume_multiple %125, 8 : i32
    %127 = arith.index_cast %126 : i32 to index
    %c0_36 = arith.constant 0 : index
    %128 = vector.load %arg15[%127, %c0_36] : memref<64x128xf32, #tpu.memory_space<vmem>>, vector<8x128xf32>
    %cst_37 = arith.constant dense<0.000000e+00> : vector<8x128xf32>
    %129 = tpu.matmul %122, %1, %cst_37 {dimension_numbers = #tpu.dot_dimension_numbers<[1], [0], [0], [1], [0, 0, 1, 1], [], []>} : vector<8x32xf32>, vector<32x128xf32>, vector<8x128xf32> -> vector<8x128xf32>
    %130 = arith.addf %128, %129 : vector<8x128xf32>
    %131 = arith.negf %130 : vector<8x128xf32>
    %132 = math.exp %131 : vector<8x128xf32>
    %cst_38 = arith.constant 1.000000e+00 : f32
    %133 = vector.broadcast %cst_38 : f32 to vector<8x128xf32>
    %134 = arith.addf %133, %132 : vector<8x128xf32>
    %135 = arith.divf %133, %134 : vector<8x128xf32>
    %136 = vector.extract_strided_slice %135 {offsets = [0, 0], sizes = [8, 32], strides = [1, 1]} : vector<8x128xf32> to vector<8x32xf32>
    %137 = vector.extract_strided_slice %135 {offsets = [0, 32], sizes = [8, 32], strides = [1, 1]} : vector<8x128xf32> to vector<8x32xf32>
    %138 = vector.extract_strided_slice %135 {offsets = [0, 96], sizes = [8, 32], strides = [1, 1]} : vector<8x128xf32> to vector<8x32xf32>
    %139 = vector.extract_strided_slice %130 {offsets = [0, 64], sizes = [8, 32], strides = [1, 1]} : vector<8x128xf32> to vector<8x32xf32>
    %140 = math.tanh %139 : vector<8x32xf32>
    %141 = arith.mulf %137, %120 : vector<8x32xf32>
    %142 = arith.mulf %136, %140 : vector<8x32xf32>
    %143 = arith.addf %141, %142 : vector<8x32xf32>
    %144 = math.tanh %143 : vector<8x32xf32>
    %145 = arith.mulf %138, %144 : vector<8x32xf32>
    %146 = arith.index_cast %126 : i32 to index
    %c0_39 = arith.constant 0 : index
    %147 = vector.load %arg14[%146, %c0_39] : memref<64x32xf32, #tpu.memory_space<vmem>>, vector<8x32xf32>
    tpu.vector_store %arg14[%146, %c0_39], %145 {strides = array<i32>} : memref<64x32xf32, #tpu.memory_space<vmem>>, vector<8x32xf32>,
    %c6_i32 = arith.constant 6 : i32
    %c8_i32_40 = arith.constant 8 : i32
    %148 = arith.muli %c6_i32, %c8_i32_40 : i32
    %149 = tpu.assume_multiple %148, 8 : i32
    %150 = arith.index_cast %149 : i32 to index
    %c0_41 = arith.constant 0 : index
    %151 = vector.load %arg15[%150, %c0_41] : memref<64x128xf32, #tpu.memory_space<vmem>>, vector<8x128xf32>
    %cst_42 = arith.constant dense<0.000000e+00> : vector<8x128xf32>
    %152 = tpu.matmul %145, %1, %cst_42 {dimension_numbers = #tpu.dot_dimension_numbers<[1], [0], [0], [1], [0, 0, 1, 1], [], []>} : vector<8x32xf32>, vector<32x128xf32>, vector<8x128xf32> -> vector<8x128xf32>
    %153 = arith.addf %151, %152 : vector<8x128xf32>
    %154 = arith.negf %153 : vector<8x128xf32>
    %155 = math.exp %154 : vector<8x128xf32>
    %cst_43 = arith.constant 1.000000e+00 : f32
    %156 = vector.broadcast %cst_43 : f32 to vector<8x128xf32>
    %157 = arith.addf %156, %155 : vector<8x128xf32>
    %158 = arith.divf %156, %157 : vector<8x128xf32>
    %159 = vector.extract_strided_slice %158 {offsets = [0, 0], sizes = [8, 32], strides = [1, 1]} : vector<8x128xf32> to vector<8x32xf32>
    %160 = vector.extract_strided_slice %158 {offsets = [0, 32], sizes = [8, 32], strides = [1, 1]} : vector<8x128xf32> to vector<8x32xf32>
    %161 = vector.extract_strided_slice %158 {offsets = [0, 96], sizes = [8, 32], strides = [1, 1]} : vector<8x128xf32> to vector<8x32xf32>
    %162 = vector.extract_strided_slice %153 {offsets = [0, 64], sizes = [8, 32], strides = [1, 1]} : vector<8x128xf32> to vector<8x32xf32>
    %163 = math.tanh %162 : vector<8x32xf32>
    %164 = arith.mulf %160, %143 : vector<8x32xf32>
    %165 = arith.mulf %159, %163 : vector<8x32xf32>
    %166 = arith.addf %164, %165 : vector<8x32xf32>
    %167 = math.tanh %166 : vector<8x32xf32>
    %168 = arith.mulf %161, %167 : vector<8x32xf32>
    %169 = arith.index_cast %149 : i32 to index
    %c0_44 = arith.constant 0 : index
    %170 = vector.load %arg14[%169, %c0_44] : memref<64x32xf32, #tpu.memory_space<vmem>>, vector<8x32xf32>
    tpu.vector_store %arg14[%169, %c0_44], %168 {strides = array<i32>} : memref<64x32xf32, #tpu.memory_space<vmem>>, vector<8x32xf32>,
    %c7_i32 = arith.constant 7 : i32
    %c8_i32_45 = arith.constant 8 : i32
    %171 = arith.muli %c7_i32, %c8_i32_45 : i32
    %172 = tpu.assume_multiple %171, 8 : i32
    %173 = arith.index_cast %172 : i32 to index
    %c0_46 = arith.constant 0 : index
    %174 = vector.load %arg15[%173, %c0_46] : memref<64x128xf32, #tpu.memory_space<vmem>>, vector<8x128xf32>
    %cst_47 = arith.constant dense<0.000000e+00> : vector<8x128xf32>
    %175 = tpu.matmul %168, %1, %cst_47 {dimension_numbers = #tpu.dot_dimension_numbers<[1], [0], [0], [1], [0, 0, 1, 1], [], []>} : vector<8x32xf32>, vector<32x128xf32>, vector<8x128xf32> -> vector<8x128xf32>
    %176 = arith.addf %174, %175 : vector<8x128xf32>
    %177 = arith.negf %176 : vector<8x128xf32>
    %178 = math.exp %177 : vector<8x128xf32>
    %cst_48 = arith.constant 1.000000e+00 : f32
    %179 = vector.broadcast %cst_48 : f32 to vector<8x128xf32>
    %180 = arith.addf %179, %178 : vector<8x128xf32>
    %181 = arith.divf %179, %180 : vector<8x128xf32>
    %182 = vector.extract_strided_slice %181 {offsets = [0, 0], sizes = [8, 32], strides = [1, 1]} : vector<8x128xf32> to vector<8x32xf32>
    %183 = vector.extract_strided_slice %181 {offsets = [0, 32], sizes = [8, 32], strides = [1, 1]} : vector<8x128xf32> to vector<8x32xf32>
    %184 = vector.extract_strided_slice %181 {offsets = [0, 96], sizes = [8, 32], strides = [1, 1]} : vector<8x128xf32> to vector<8x32xf32>
    %185 = vector.extract_strided_slice %176 {offsets = [0, 64], sizes = [8, 32], strides = [1, 1]} : vector<8x128xf32> to vector<8x32xf32>
    %186 = math.tanh %185 : vector<8x32xf32>
    %187 = arith.mulf %183, %166 : vector<8x32xf32>
    %188 = arith.mulf %182, %186 : vector<8x32xf32>
    %189 = arith.addf %187, %188 : vector<8x32xf32>
    %190 = math.tanh %189 : vector<8x32xf32>
    %191 = arith.mulf %184, %190 : vector<8x32xf32>
    %192 = arith.index_cast %172 : i32 to index
    %c0_49 = arith.constant 0 : index
    %193 = vector.load %arg14[%192, %c0_49] : memref<64x32xf32, #tpu.memory_space<vmem>>, vector<8x32xf32>
    tpu.vector_store %arg14[%192, %c0_49], %191 {strides = array<i32>} : memref<64x32xf32, #tpu.memory_space<vmem>>, vector<8x32xf32>,
    %c8_i32_50 = arith.constant 8 : i32
    %c0_51 = arith.constant 0 : index
    %c0_52 = arith.constant 0 : index
    %194 = vector.load %arg4[%c0_51, %c0_52] : memref<32x128xf32, #tpu.memory_space<vmem>>, vector<32x128xf32>
    %c0_53 = arith.constant 0 : index
    %c0_54 = arith.constant 0 : index
    %195 = vector.load %arg5[%c0_53, %c0_54] : memref<32x128xf32, #tpu.memory_space<vmem>>, vector<32x128xf32>
    %c0_55 = arith.constant 0 : index
    %c0_56 = arith.constant 0 : index
    %196 = vector.load %arg6[%c0_55, %c0_56] : memref<1x128xf32, #tpu.memory_space<vmem>>, vector<1x128xf32>
    %c0_57 = arith.constant 0 : index
    %c0_58 = arith.constant 0 : index
    %197 = vector.load %arg14[%c0_57, %c0_58] : memref<64x32xf32, #tpu.memory_space<vmem>>, vector<64x32xf32>
    %cst_59 = arith.constant dense<0.000000e+00> : vector<64x128xf32>
    %198 = tpu.matmul %197, %194, %cst_59 {dimension_numbers = #tpu.dot_dimension_numbers<[1], [0], [0], [1], [0, 0, 1, 1], [], []>} : vector<64x32xf32>, vector<32x128xf32>, vector<64x128xf32> -> vector<64x128xf32>
    %199 = vector.broadcast %196 : vector<1x128xf32> to vector<64x128xf32>
    %200 = arith.addf %198, %199 : vector<64x128xf32>
    %c0_60 = arith.constant 0 : index
    %c0_61 = arith.constant 0 : index
    %201 = vector.load %arg15[%c0_60, %c0_61] : memref<64x128xf32, #tpu.memory_space<vmem>>, vector<64x128xf32>
    tpu.vector_store %arg15[%c0_60, %c0_61], %200 {strides = array<i32>} : memref<64x128xf32, #tpu.memory_space<vmem>>, vector<64x128xf32>,
    %cst_62 = arith.constant 0.000000e+00 : f32
    %202 = vector.broadcast %cst_62 : f32 to vector<8x32xf32>
    %cst_63 = arith.constant 0.000000e+00 : f32
    %203 = vector.broadcast %cst_63 : f32 to vector<8x32xf32>
    %c0_i32_64 = arith.constant 0 : i32
    %c8_i32_65 = arith.constant 8 : i32
    %204 = arith.muli %c0_i32_64, %c8_i32_65 : i32
    %205 = tpu.assume_multiple %204, 8 : i32
    %206 = arith.index_cast %205 : i32 to index
    %c0_66 = arith.constant 0 : index
    %207 = vector.load %arg15[%206, %c0_66] : memref<64x128xf32, #tpu.memory_space<vmem>>, vector<8x128xf32>
    %cst_67 = arith.constant dense<0.000000e+00> : vector<8x128xf32>
    %208 = tpu.matmul %202, %195, %cst_67 {dimension_numbers = #tpu.dot_dimension_numbers<[1], [0], [0], [1], [0, 0, 1, 1], [], []>} : vector<8x32xf32>, vector<32x128xf32>, vector<8x128xf32> -> vector<8x128xf32>
    %209 = arith.addf %207, %208 : vector<8x128xf32>
    %210 = arith.negf %209 : vector<8x128xf32>
    %211 = math.exp %210 : vector<8x128xf32>
    %cst_68 = arith.constant 1.000000e+00 : f32
    %212 = vector.broadcast %cst_68 : f32 to vector<8x128xf32>
    %213 = arith.addf %212, %211 : vector<8x128xf32>
    %214 = arith.divf %212, %213 : vector<8x128xf32>
    %215 = vector.extract_strided_slice %214 {offsets = [0, 0], sizes = [8, 32], strides = [1, 1]} : vector<8x128xf32> to vector<8x32xf32>
    %216 = vector.extract_strided_slice %214 {offsets = [0, 32], sizes = [8, 32], strides = [1, 1]} : vector<8x128xf32> to vector<8x32xf32>
    %217 = vector.extract_strided_slice %214 {offsets = [0, 96], sizes = [8, 32], strides = [1, 1]} : vector<8x128xf32> to vector<8x32xf32>
    %218 = vector.extract_strided_slice %209 {offsets = [0, 64], sizes = [8, 32], strides = [1, 1]} : vector<8x128xf32> to vector<8x32xf32>
    %219 = math.tanh %218 : vector<8x32xf32>
    %220 = arith.mulf %216, %203 : vector<8x32xf32>
    %221 = arith.mulf %215, %219 : vector<8x32xf32>
    %222 = arith.addf %220, %221 : vector<8x32xf32>
    %223 = math.tanh %222 : vector<8x32xf32>
    %224 = arith.mulf %217, %223 : vector<8x32xf32>
    %225 = arith.index_cast %205 : i32 to index
    %c0_69 = arith.constant 0 : index
    %226 = vector.load %arg14[%225, %c0_69] : memref<64x32xf32, #tpu.memory_space<vmem>>, vector<8x32xf32>
    tpu.vector_store %arg14[%225, %c0_69], %224 {strides = array<i32>} : memref<64x32xf32, #tpu.memory_space<vmem>>, vector<8x32xf32>,
    %c1_i32_70 = arith.constant 1 : i32
    %c8_i32_71 = arith.constant 8 : i32
    %227 = arith.muli %c1_i32_70, %c8_i32_71 : i32
    %228 = tpu.assume_multiple %227, 8 : i32
    %229 = arith.index_cast %228 : i32 to index
    %c0_72 = arith.constant 0 : index
    %230 = vector.load %arg15[%229, %c0_72] : memref<64x128xf32, #tpu.memory_space<vmem>>, vector<8x128xf32>
    %cst_73 = arith.constant dense<0.000000e+00> : vector<8x128xf32>
    %231 = tpu.matmul %224, %195, %cst_73 {dimension_numbers = #tpu.dot_dimension_numbers<[1], [0], [0], [1], [0, 0, 1, 1], [], []>} : vector<8x32xf32>, vector<32x128xf32>, vector<8x128xf32> -> vector<8x128xf32>
    %232 = arith.addf %230, %231 : vector<8x128xf32>
    %233 = arith.negf %232 : vector<8x128xf32>
    %234 = math.exp %233 : vector<8x128xf32>
    %cst_74 = arith.constant 1.000000e+00 : f32
    %235 = vector.broadcast %cst_74 : f32 to vector<8x128xf32>
    %236 = arith.addf %235, %234 : vector<8x128xf32>
    %237 = arith.divf %235, %236 : vector<8x128xf32>
    %238 = vector.extract_strided_slice %237 {offsets = [0, 0], sizes = [8, 32], strides = [1, 1]} : vector<8x128xf32> to vector<8x32xf32>
    %239 = vector.extract_strided_slice %237 {offsets = [0, 32], sizes = [8, 32], strides = [1, 1]} : vector<8x128xf32> to vector<8x32xf32>
    %240 = vector.extract_strided_slice %237 {offsets = [0, 96], sizes = [8, 32], strides = [1, 1]} : vector<8x128xf32> to vector<8x32xf32>
    %241 = vector.extract_strided_slice %232 {offsets = [0, 64], sizes = [8, 32], strides = [1, 1]} : vector<8x128xf32> to vector<8x32xf32>
    %242 = math.tanh %241 : vector<8x32xf32>
    %243 = arith.mulf %239, %222 : vector<8x32xf32>
    %244 = arith.mulf %238, %242 : vector<8x32xf32>
    %245 = arith.addf %243, %244 : vector<8x32xf32>
    %246 = math.tanh %245 : vector<8x32xf32>
    %247 = arith.mulf %240, %246 : vector<8x32xf32>
    %248 = arith.index_cast %228 : i32 to index
    %c0_75 = arith.constant 0 : index
    %249 = vector.load %arg14[%248, %c0_75] : memref<64x32xf32, #tpu.memory_space<vmem>>, vector<8x32xf32>
    tpu.vector_store %arg14[%248, %c0_75], %247 {strides = array<i32>} : memref<64x32xf32, #tpu.memory_space<vmem>>, vector<8x32xf32>,
    %c2_i32_76 = arith.constant 2 : i32
    %c8_i32_77 = arith.constant 8 : i32
    %250 = arith.muli %c2_i32_76, %c8_i32_77 : i32
    %251 = tpu.assume_multiple %250, 8 : i32
    %252 = arith.index_cast %251 : i32 to index
    %c0_78 = arith.constant 0 : index
    %253 = vector.load %arg15[%252, %c0_78] : memref<64x128xf32, #tpu.memory_space<vmem>>, vector<8x128xf32>
    %cst_79 = arith.constant dense<0.000000e+00> : vector<8x128xf32>
    %254 = tpu.matmul %247, %195, %cst_79 {dimension_numbers = #tpu.dot_dimension_numbers<[1], [0], [0], [1], [0, 0, 1, 1], [], []>} : vector<8x32xf32>, vector<32x128xf32>, vector<8x128xf32> -> vector<8x128xf32>
    %255 = arith.addf %253, %254 : vector<8x128xf32>
    %256 = arith.negf %255 : vector<8x128xf32>
    %257 = math.exp %256 : vector<8x128xf32>
    %cst_80 = arith.constant 1.000000e+00 : f32
    %258 = vector.broadcast %cst_80 : f32 to vector<8x128xf32>
    %259 = arith.addf %258, %257 : vector<8x128xf32>
    %260 = arith.divf %258, %259 : vector<8x128xf32>
    %261 = vector.extract_strided_slice %260 {offsets = [0, 0], sizes = [8, 32], strides = [1, 1]} : vector<8x128xf32> to vector<8x32xf32>
    %262 = vector.extract_strided_slice %260 {offsets = [0, 32], sizes = [8, 32], strides = [1, 1]} : vector<8x128xf32> to vector<8x32xf32>
    %263 = vector.extract_strided_slice %260 {offsets = [0, 96], sizes = [8, 32], strides = [1, 1]} : vector<8x128xf32> to vector<8x32xf32>
    %264 = vector.extract_strided_slice %255 {offsets = [0, 64], sizes = [8, 32], strides = [1, 1]} : vector<8x128xf32> to vector<8x32xf32>
    %265 = math.tanh %264 : vector<8x32xf32>
    %266 = arith.mulf %262, %245 : vector<8x32xf32>
    %267 = arith.mulf %261, %265 : vector<8x32xf32>
    %268 = arith.addf %266, %267 : vector<8x32xf32>
    %269 = math.tanh %268 : vector<8x32xf32>
    %270 = arith.mulf %263, %269 : vector<8x32xf32>
    %271 = arith.index_cast %251 : i32 to index
    %c0_81 = arith.constant 0 : index
    %272 = vector.load %arg14[%271, %c0_81] : memref<64x32xf32, #tpu.memory_space<vmem>>, vector<8x32xf32>
    tpu.vector_store %arg14[%271, %c0_81], %270 {strides = array<i32>} : memref<64x32xf32, #tpu.memory_space<vmem>>, vector<8x32xf32>,
    %c3_i32_82 = arith.constant 3 : i32
    %c8_i32_83 = arith.constant 8 : i32
    %273 = arith.muli %c3_i32_82, %c8_i32_83 : i32
    %274 = tpu.assume_multiple %273, 8 : i32
    %275 = arith.index_cast %274 : i32 to index
    %c0_84 = arith.constant 0 : index
    %276 = vector.load %arg15[%275, %c0_84] : memref<64x128xf32, #tpu.memory_space<vmem>>, vector<8x128xf32>
    %cst_85 = arith.constant dense<0.000000e+00> : vector<8x128xf32>
    %277 = tpu.matmul %270, %195, %cst_85 {dimension_numbers = #tpu.dot_dimension_numbers<[1], [0], [0], [1], [0, 0, 1, 1], [], []>} : vector<8x32xf32>, vector<32x128xf32>, vector<8x128xf32> -> vector<8x128xf32>
    %278 = arith.addf %276, %277 : vector<8x128xf32>
    %279 = arith.negf %278 : vector<8x128xf32>
    %280 = math.exp %279 : vector<8x128xf32>
    %cst_86 = arith.constant 1.000000e+00 : f32
    %281 = vector.broadcast %cst_86 : f32 to vector<8x128xf32>
    %282 = arith.addf %281, %280 : vector<8x128xf32>
    %283 = arith.divf %281, %282 : vector<8x128xf32>
    %284 = vector.extract_strided_slice %283 {offsets = [0, 0], sizes = [8, 32], strides = [1, 1]} : vector<8x128xf32> to vector<8x32xf32>
    %285 = vector.extract_strided_slice %283 {offsets = [0, 32], sizes = [8, 32], strides = [1, 1]} : vector<8x128xf32> to vector<8x32xf32>
    %286 = vector.extract_strided_slice %283 {offsets = [0, 96], sizes = [8, 32], strides = [1, 1]} : vector<8x128xf32> to vector<8x32xf32>
    %287 = vector.extract_strided_slice %278 {offsets = [0, 64], sizes = [8, 32], strides = [1, 1]} : vector<8x128xf32> to vector<8x32xf32>
    %288 = math.tanh %287 : vector<8x32xf32>
    %289 = arith.mulf %285, %268 : vector<8x32xf32>
    %290 = arith.mulf %284, %288 : vector<8x32xf32>
    %291 = arith.addf %289, %290 : vector<8x32xf32>
    %292 = math.tanh %291 : vector<8x32xf32>
    %293 = arith.mulf %286, %292 : vector<8x32xf32>
    %294 = arith.index_cast %274 : i32 to index
    %c0_87 = arith.constant 0 : index
    %295 = vector.load %arg14[%294, %c0_87] : memref<64x32xf32, #tpu.memory_space<vmem>>, vector<8x32xf32>
    tpu.vector_store %arg14[%294, %c0_87], %293 {strides = array<i32>} : memref<64x32xf32, #tpu.memory_space<vmem>>, vector<8x32xf32>,
    %c4_i32_88 = arith.constant 4 : i32
    %c8_i32_89 = arith.constant 8 : i32
    %296 = arith.muli %c4_i32_88, %c8_i32_89 : i32
    %297 = tpu.assume_multiple %296, 8 : i32
    %298 = arith.index_cast %297 : i32 to index
    %c0_90 = arith.constant 0 : index
    %299 = vector.load %arg15[%298, %c0_90] : memref<64x128xf32, #tpu.memory_space<vmem>>, vector<8x128xf32>
    %cst_91 = arith.constant dense<0.000000e+00> : vector<8x128xf32>
    %300 = tpu.matmul %293, %195, %cst_91 {dimension_numbers = #tpu.dot_dimension_numbers<[1], [0], [0], [1], [0, 0, 1, 1], [], []>} : vector<8x32xf32>, vector<32x128xf32>, vector<8x128xf32> -> vector<8x128xf32>
    %301 = arith.addf %299, %300 : vector<8x128xf32>
    %302 = arith.negf %301 : vector<8x128xf32>
    %303 = math.exp %302 : vector<8x128xf32>
    %cst_92 = arith.constant 1.000000e+00 : f32
    %304 = vector.broadcast %cst_92 : f32 to vector<8x128xf32>
    %305 = arith.addf %304, %303 : vector<8x128xf32>
    %306 = arith.divf %304, %305 : vector<8x128xf32>
    %307 = vector.extract_strided_slice %306 {offsets = [0, 0], sizes = [8, 32], strides = [1, 1]} : vector<8x128xf32> to vector<8x32xf32>
    %308 = vector.extract_strided_slice %306 {offsets = [0, 32], sizes = [8, 32], strides = [1, 1]} : vector<8x128xf32> to vector<8x32xf32>
    %309 = vector.extract_strided_slice %306 {offsets = [0, 96], sizes = [8, 32], strides = [1, 1]} : vector<8x128xf32> to vector<8x32xf32>
    %310 = vector.extract_strided_slice %301 {offsets = [0, 64], sizes = [8, 32], strides = [1, 1]} : vector<8x128xf32> to vector<8x32xf32>
    %311 = math.tanh %310 : vector<8x32xf32>
    %312 = arith.mulf %308, %291 : vector<8x32xf32>
    %313 = arith.mulf %307, %311 : vector<8x32xf32>
    %314 = arith.addf %312, %313 : vector<8x32xf32>
    %315 = math.tanh %314 : vector<8x32xf32>
    %316 = arith.mulf %309, %315 : vector<8x32xf32>
    %317 = arith.index_cast %297 : i32 to index
    %c0_93 = arith.constant 0 : index
    %318 = vector.load %arg14[%317, %c0_93] : memref<64x32xf32, #tpu.memory_space<vmem>>, vector<8x32xf32>
    tpu.vector_store %arg14[%317, %c0_93], %316 {strides = array<i32>} : memref<64x32xf32, #tpu.memory_space<vmem>>, vector<8x32xf32>,
    %c5_i32_94 = arith.constant 5 : i32
    %c8_i32_95 = arith.constant 8 : i32
    %319 = arith.muli %c5_i32_94, %c8_i32_95 : i32
    %320 = tpu.assume_multiple %319, 8 : i32
    %321 = arith.index_cast %320 : i32 to index
    %c0_96 = arith.constant 0 : index
    %322 = vector.load %arg15[%321, %c0_96] : memref<64x128xf32, #tpu.memory_space<vmem>>, vector<8x128xf32>
    %cst_97 = arith.constant dense<0.000000e+00> : vector<8x128xf32>
    %323 = tpu.matmul %316, %195, %cst_97 {dimension_numbers = #tpu.dot_dimension_numbers<[1], [0], [0], [1], [0, 0, 1, 1], [], []>} : vector<8x32xf32>, vector<32x128xf32>, vector<8x128xf32> -> vector<8x128xf32>
    %324 = arith.addf %322, %323 : vector<8x128xf32>
    %325 = arith.negf %324 : vector<8x128xf32>
    %326 = math.exp %325 : vector<8x128xf32>
    %cst_98 = arith.constant 1.000000e+00 : f32
    %327 = vector.broadcast %cst_98 : f32 to vector<8x128xf32>
    %328 = arith.addf %327, %326 : vector<8x128xf32>
    %329 = arith.divf %327, %328 : vector<8x128xf32>
    %330 = vector.extract_strided_slice %329 {offsets = [0, 0], sizes = [8, 32], strides = [1, 1]} : vector<8x128xf32> to vector<8x32xf32>
    %331 = vector.extract_strided_slice %329 {offsets = [0, 32], sizes = [8, 32], strides = [1, 1]} : vector<8x128xf32> to vector<8x32xf32>
    %332 = vector.extract_strided_slice %329 {offsets = [0, 96], sizes = [8, 32], strides = [1, 1]} : vector<8x128xf32> to vector<8x32xf32>
    %333 = vector.extract_strided_slice %324 {offsets = [0, 64], sizes = [8, 32], strides = [1, 1]} : vector<8x128xf32> to vector<8x32xf32>
    %334 = math.tanh %333 : vector<8x32xf32>
    %335 = arith.mulf %331, %314 : vector<8x32xf32>
    %336 = arith.mulf %330, %334 : vector<8x32xf32>
    %337 = arith.addf %335, %336 : vector<8x32xf32>
    %338 = math.tanh %337 : vector<8x32xf32>
    %339 = arith.mulf %332, %338 : vector<8x32xf32>
    %340 = arith.index_cast %320 : i32 to index
    %c0_99 = arith.constant 0 : index
    %341 = vector.load %arg14[%340, %c0_99] : memref<64x32xf32, #tpu.memory_space<vmem>>, vector<8x32xf32>
    tpu.vector_store %arg14[%340, %c0_99], %339 {strides = array<i32>} : memref<64x32xf32, #tpu.memory_space<vmem>>, vector<8x32xf32>,
    %c6_i32_100 = arith.constant 6 : i32
    %c8_i32_101 = arith.constant 8 : i32
    %342 = arith.muli %c6_i32_100, %c8_i32_101 : i32
    %343 = tpu.assume_multiple %342, 8 : i32
    %344 = arith.index_cast %343 : i32 to index
    %c0_102 = arith.constant 0 : index
    %345 = vector.load %arg15[%344, %c0_102] : memref<64x128xf32, #tpu.memory_space<vmem>>, vector<8x128xf32>
    %cst_103 = arith.constant dense<0.000000e+00> : vector<8x128xf32>
    %346 = tpu.matmul %339, %195, %cst_103 {dimension_numbers = #tpu.dot_dimension_numbers<[1], [0], [0], [1], [0, 0, 1, 1], [], []>} : vector<8x32xf32>, vector<32x128xf32>, vector<8x128xf32> -> vector<8x128xf32>
    %347 = arith.addf %345, %346 : vector<8x128xf32>
    %348 = arith.negf %347 : vector<8x128xf32>
    %349 = math.exp %348 : vector<8x128xf32>
    %cst_104 = arith.constant 1.000000e+00 : f32
    %350 = vector.broadcast %cst_104 : f32 to vector<8x128xf32>
    %351 = arith.addf %350, %349 : vector<8x128xf32>
    %352 = arith.divf %350, %351 : vector<8x128xf32>
    %353 = vector.extract_strided_slice %352 {offsets = [0, 0], sizes = [8, 32], strides = [1, 1]} : vector<8x128xf32> to vector<8x32xf32>
    %354 = vector.extract_strided_slice %352 {offsets = [0, 32], sizes = [8, 32], strides = [1, 1]} : vector<8x128xf32> to vector<8x32xf32>
    %355 = vector.extract_strided_slice %352 {offsets = [0, 96], sizes = [8, 32], strides = [1, 1]} : vector<8x128xf32> to vector<8x32xf32>
    %356 = vector.extract_strided_slice %347 {offsets = [0, 64], sizes = [8, 32], strides = [1, 1]} : vector<8x128xf32> to vector<8x32xf32>
    %357 = math.tanh %356 : vector<8x32xf32>
    %358 = arith.mulf %354, %337 : vector<8x32xf32>
    %359 = arith.mulf %353, %357 : vector<8x32xf32>
    %360 = arith.addf %358, %359 : vector<8x32xf32>
    %361 = math.tanh %360 : vector<8x32xf32>
    %362 = arith.mulf %355, %361 : vector<8x32xf32>
    %363 = arith.index_cast %343 : i32 to index
    %c0_105 = arith.constant 0 : index
    %364 = vector.load %arg14[%363, %c0_105] : memref<64x32xf32, #tpu.memory_space<vmem>>, vector<8x32xf32>
    tpu.vector_store %arg14[%363, %c0_105], %362 {strides = array<i32>} : memref<64x32xf32, #tpu.memory_space<vmem>>, vector<8x32xf32>,
    %c7_i32_106 = arith.constant 7 : i32
    %c8_i32_107 = arith.constant 8 : i32
    %365 = arith.muli %c7_i32_106, %c8_i32_107 : i32
    %366 = tpu.assume_multiple %365, 8 : i32
    %367 = arith.index_cast %366 : i32 to index
    %c0_108 = arith.constant 0 : index
    %368 = vector.load %arg15[%367, %c0_108] : memref<64x128xf32, #tpu.memory_space<vmem>>, vector<8x128xf32>
    %cst_109 = arith.constant dense<0.000000e+00> : vector<8x128xf32>
    %369 = tpu.matmul %362, %195, %cst_109 {dimension_numbers = #tpu.dot_dimension_numbers<[1], [0], [0], [1], [0, 0, 1, 1], [], []>} : vector<8x32xf32>, vector<32x128xf32>, vector<8x128xf32> -> vector<8x128xf32>
    %370 = arith.addf %368, %369 : vector<8x128xf32>
    %371 = arith.negf %370 : vector<8x128xf32>
    %372 = math.exp %371 : vector<8x128xf32>
    %cst_110 = arith.constant 1.000000e+00 : f32
    %373 = vector.broadcast %cst_110 : f32 to vector<8x128xf32>
    %374 = arith.addf %373, %372 : vector<8x128xf32>
    %375 = arith.divf %373, %374 : vector<8x128xf32>
    %376 = vector.extract_strided_slice %375 {offsets = [0, 0], sizes = [8, 32], strides = [1, 1]} : vector<8x128xf32> to vector<8x32xf32>
    %377 = vector.extract_strided_slice %375 {offsets = [0, 32], sizes = [8, 32], strides = [1, 1]} : vector<8x128xf32> to vector<8x32xf32>
    %378 = vector.extract_strided_slice %375 {offsets = [0, 96], sizes = [8, 32], strides = [1, 1]} : vector<8x128xf32> to vector<8x32xf32>
    %379 = vector.extract_strided_slice %370 {offsets = [0, 64], sizes = [8, 32], strides = [1, 1]} : vector<8x128xf32> to vector<8x32xf32>
    %380 = math.tanh %379 : vector<8x32xf32>
    %381 = arith.mulf %377, %360 : vector<8x32xf32>
    %382 = arith.mulf %376, %380 : vector<8x32xf32>
    %383 = arith.addf %381, %382 : vector<8x32xf32>
    %384 = math.tanh %383 : vector<8x32xf32>
    %385 = arith.mulf %378, %384 : vector<8x32xf32>
    %386 = arith.index_cast %366 : i32 to index
    %c0_111 = arith.constant 0 : index
    %387 = vector.load %arg14[%386, %c0_111] : memref<64x32xf32, #tpu.memory_space<vmem>>, vector<8x32xf32>
    tpu.vector_store %arg14[%386, %c0_111], %385 {strides = array<i32>} : memref<64x32xf32, #tpu.memory_space<vmem>>, vector<8x32xf32>,
    %c8_i32_112 = arith.constant 8 : i32
    %c0_113 = arith.constant 0 : index
    %c0_114 = arith.constant 0 : index
    %388 = vector.load %arg14[%c0_113, %c0_114] : memref<64x32xf32, #tpu.memory_space<vmem>>, vector<64x32xf32>
    %c0_115 = arith.constant 0 : index
    %c0_116 = arith.constant 0 : index
    %389 = vector.load %arg7[%c0_115, %c0_116] : memref<32x128xf32, #tpu.memory_space<vmem>>, vector<32x128xf32>
    %cst_117 = arith.constant dense<0.000000e+00> : vector<64x128xf32>
    %390 = tpu.matmul %388, %389, %cst_117 {dimension_numbers = #tpu.dot_dimension_numbers<[1], [0], [0], [1], [0, 0, 1, 1], [], []>} : vector<64x32xf32>, vector<32x128xf32>, vector<64x128xf32> -> vector<64x128xf32>
    %c0_118 = arith.constant 0 : index
    %c0_119 = arith.constant 0 : index
    %391 = vector.load %arg8[%c0_118, %c0_119] : memref<1x128xf32, #tpu.memory_space<vmem>>, vector<1x128xf32>
    %392 = vector.broadcast %391 : vector<1x128xf32> to vector<64x128xf32>
    %393 = arith.addf %390, %392 : vector<64x128xf32>
    %cst_120 = arith.constant 0.000000e+00 : f32
    %394 = vector.broadcast %cst_120 : f32 to vector<64x128xf32>
    %395 = arith.maximumf %393, %394 : vector<64x128xf32>
    %c0_121 = arith.constant 0 : index
    %c0_122 = arith.constant 0 : index
    %396 = vector.load %arg9[%c0_121, %c0_122] : memref<128x128xf32, #tpu.memory_space<vmem>>, vector<128x128xf32>
    %cst_123 = arith.constant dense<0.000000e+00> : vector<64x128xf32>
    %397 = tpu.matmul %395, %396, %cst_123 {dimension_numbers = #tpu.dot_dimension_numbers<[1], [0], [0], [1], [0, 0, 1, 1], [], []>} : vector<64x128xf32>, vector<128x128xf32>, vector<64x128xf32> -> vector<64x128xf32>
    %c0_124 = arith.constant 0 : index
    %c0_125 = arith.constant 0 : index
    %398 = vector.load %arg10[%c0_124, %c0_125] : memref<1x128xf32, #tpu.memory_space<vmem>>, vector<1x128xf32>
    %399 = vector.broadcast %398 : vector<1x128xf32> to vector<64x128xf32>
    %400 = arith.addf %397, %399 : vector<64x128xf32>
    %cst_126 = arith.constant 0.000000e+00 : f32
    %401 = vector.broadcast %cst_126 : f32 to vector<64x128xf32>
    %402 = arith.maximumf %400, %401 : vector<64x128xf32>
    %c0_127 = arith.constant 0 : index
    %c0_128 = arith.constant 0 : index
    %403 = vector.load %arg11[%c0_127, %c0_128] : memref<128x128xf32, #tpu.memory_space<vmem>>, vector<128x128xf32>
    %cst_129 = arith.constant dense<0.000000e+00> : vector<64x128xf32>
    %404 = tpu.matmul %402, %403, %cst_129 {dimension_numbers = #tpu.dot_dimension_numbers<[1], [0], [0], [1], [0, 0, 1, 1], [], []>} : vector<64x128xf32>, vector<128x128xf32>, vector<64x128xf32> -> vector<64x128xf32>
    %c0_130 = arith.constant 0 : index
    %c0_131 = arith.constant 0 : index
    %405 = vector.load %arg12[%c0_130, %c0_131] : memref<1x128xf32, #tpu.memory_space<vmem>>, vector<1x128xf32>
    %406 = vector.broadcast %405 : vector<1x128xf32> to vector<64x128xf32>
    %407 = arith.addf %404, %406 : vector<64x128xf32>
    %cst_132 = arith.constant dense<0xFF800000> : vector<64xf32>
    %408 = vector.multi_reduction <maximumf>, %407, %cst_132 [1] : vector<64x128xf32> to vector<64xf32>
    %409 = vector.shape_cast %408 : vector<64xf32> to vector<64x1xf32>
    %410 = vector.broadcast %409 : vector<64x1xf32> to vector<64x128xf32>
    %411 = arith.subf %407, %410 : vector<64x128xf32>
    %412 = math.exp %411 : vector<64x128xf32>
    %cst_133 = arith.constant dense<0.000000e+00> : vector<64xf32>
    %413 = vector.multi_reduction <add>, %412, %cst_133 [1] : vector<64x128xf32> to vector<64xf32>
    %414 = vector.shape_cast %413 : vector<64xf32> to vector<64x1xf32>
    %415 = tpu.reciprocal %414 {approx = true} : vector<64x1xf32> -> vector<64x1xf32>
    %416 = vector.broadcast %415 : vector<64x1xf32> to vector<64x128xf32>
    %417 = arith.mulf %412, %416 : vector<64x128xf32>
    %c0_134 = arith.constant 0 : index
    %c0_135 = arith.constant 0 : index
    %418 = vector.load %arg13[%c0_134, %c0_135] : memref<64x128xf32, #tpu.memory_space<vmem>>, vector<64x128xf32>
    tpu.vector_store %arg13[%c0_134, %c0_135], %417 {strides = array<i32>} : memref<64x128xf32, #tpu.memory_space<vmem>>, vector<64x128xf32>,
    return
  }
}

</mosaic_0001>

<bundles_post_ra>
// kernel: tpu_custom_call.1
= control target key start
LH: loop header
LB: loop body
LE: loop exit
PB: predicated region body
PF: predicated region fallthrough
CT: control target
= control target key end

     0   :  { %18 = vsyncpa [#allocation5], 0  ;;  %s2531_s0 = inlined_call_operand.vmem [shape: f32[64,16], index: 0, kind: input, shape index: {}]   ;;  %s2532_s1 = inlined_call_operand.vmem [shape: f32[16,128], index: 1, kind: input, shape index: {}]   ;;  %s2533_s2 = inlined_call_operand.vmem [shape: f32[32,128], index: 2, kind: input, shape index: {}]   ;;  %s2534_s3 = inlined_call_operand.vmem [shape: f32[1,128], index: 3, kind: input, shape index: {}]   ;;  %s2535_s4 = inlined_call_operand.vmem [shape: f32[32,128], index: 4, kind: input, shape index: {}]   ;;  %s2536_s5 = inlined_call_operand.hbm [shape: f32[32,128], index: 5, kind: input, shape index: {}]   ;;  %s2537_s6 = inlined_call_operand.vmem [shape: f32[1,128], index: 6, kind: input, shape index: {}]   ;;  %s2538_s7 = inlined_call_operand.hbm [shape: f32[32,128], index: 7, kind: input, shape index: {}]   ;;  %s2539_s8 = inlined_call_operand.vmem [shape: f32[1,128], index: 8, kind: input, shape index: {}]   ;;  %s2540_s9 = inlined_call_operand.hbm [shape: f32[128,128], index: 9, kind: input, shape index: {}]   ;;  %s2541_s10 = inlined_call_operand.vmem [shape: f32[1,128], index: 10, kind: input, shape index: {}]   ;;  %s2542_s11 = inlined_call_operand.hbm [shape: f32[128,128], index: 11, kind: input, shape index: {}]   ;;  %s2543_s12 = inlined_call_operand.vmem [shape: f32[1,128], index: 12, kind: input, shape index: {}]   ;;  %s2544_s13 = inlined_call_operand.hbm [shape: f32[64,128], index: 13, kind: output, shape index: {}]  }
   0x1   :  { %19 = vsyncpa [#allocation8], 0 }
   0x2   :  { %20 = vsyncpa [#allocation11], 0 }
   0x3   :  { %21 = vsyncpa [#allocation6], 0  ;;  %s51_s27 = sshll.u32 %s2538_s7, 4  ;;  %s2059_s28 = smov [#allocation7]   ;;  %s52_s27 = int_to_ptr.hbm [resolvable:$true] %s51_s27 }
   0x4   :  { %s53_s29 = sshll.u32 %s2059_s28, 4  ;;  %s36_s15 = sshll.u32 %s2536_s5, 4  ;;  %s54_s29 = int_to_ptr.vmem [resolvable:$true] %s53_s29  ;;  %s37_s15 = int_to_ptr.hbm [resolvable:$true] %s36_s15 }
   0x5   :  { %s2060_s16 = smov 128   ;;  %s2061_s17 = smov 8  }
   0x6   :  { %59 = dma.hbm_to_vmem [thread:$0]  %s52_s27, 512, %s54_s29, [#allocation8], %s2060_s16, %s2060_s16, %s2061_s17  }
   0x7   :  { %s2062_s18 = smov [#allocation4]   ;;  %s66_s7 = sshll.u32 %s2540_s9, 4  ;;  %s67_s7 = int_to_ptr.hbm [resolvable:$true] %s66_s7 }
   0x8   :  { %s38_s19 = sshll.u32 %s2062_s18, 4  ;;  %s81_s23 = sshll.u32 %s2542_s11, 4  ;;  %s39_s19 = int_to_ptr.vmem [resolvable:$true] %s38_s19  ;;  %s82_s23 = int_to_ptr.hbm [resolvable:$true] %s81_s23 }
   0x9   :  { %44 = dma.hbm_to_vmem [thread:$0]  %s37_s15, 512, %s39_s19, [#allocation5], %s2060_s16, %s2060_s16, %s2061_s17  }
   0xa   :  { %s2063_s24 = smov [#allocation9]   ;;  %s2064_s26 = smov [#allocation10]  }
   0xb   :  { %s68_s25 = sshll.u32 %s2063_s24, 4  ;;  %s83_s9 = sshll.u32 %s2064_s26, 4  ;;  %s69_s25 = int_to_ptr.vmem [resolvable:$true] %s68_s25  ;;  %s84_s9 = int_to_ptr.vmem [resolvable:$true] %s83_s9 }
   0xc   :  { %74 = dma.hbm_to_vmem [thread:$0]  %s67_s7, 2048, %s69_s25, [#allocation8], %s2060_s16, %s2060_s16, %s2061_s17  }
   0xd   :  { %89 = dma.hbm_to_vmem [thread:$0]  %s82_s23, 2048, %s84_s9, [#allocation11], %s2060_s16, %s2060_s16, %s2061_s17  }
   0xe   :  { %2051 = dma.done.wait [#allocation5], 512  }
   0xf   :  { %2052 = vsyncadd [#allocation5], 4294966784 }
  0x10   :  { %2053 = dma.done.wait [#allocation8], 2560  }
  0x11   :  { %2054 = vsyncadd [#allocation8], 4294964736 }
  0x12   :  { %2055 = dma.done.wait [#allocation11], 2048  }
  0x13   :  { %2056 = vsyncadd [#allocation11], 4294965248  ;;  %v109_v0 = vld [vmem:[%s2532_s1 + $0x8] sm:$0xff]  ;;  %v108_v1 = vld [vmem:[%s2532_s1] sm:$0xff]  ;;  %vm126_vm0 = vcmask 130048   ;;  %v2065_v8 = vmov 0.0  }
  0x14   :  { %1737 = vmatpush.msra.mxu3 %v109_v0  ;;  %v122_v2 = vld [vmem:[%s2531_s0 + $0x38] sm:$0xff]  ;;  %165 = vmatpush.msra.mxu0 %v109_v0  ;;  %v115_v4 = vld [vmem:[%s2531_s0] sm:$0xff]  ;;  %v2186_v5 = vld [vmem:[%s2533_s2 + $0x10] sm:$0xff]  ;;  %s2066_s25 = smov 64   ;;  %vm201_vm5 = vcmask 261120   ;;  %s1668_s30 = sshll.u32 %s2544_s13, 4  ;;  %s1669_s30 = int_to_ptr.hbm [resolvable:$true] %s1668_s30 }
  0x15   :  { %v2175_v3 = vld [vmem:[%s2533_s2 + $0x18] sm:$0xff]  ;;  %v2194_v6 = vld [vmem:[%s2533_s2 + $0x8] sm:$0xff]  ;;  %v2202_v7 = vld [vmem:[%s2533_s2] sm:$0xff] }
  0x16   :  { %284 = vmatpush.msra.mxu2 %v2175_v3  ;;  %420 = vmatpush.msra.mxu1 %v2175_v3  ;;  %v2231_v11 = vld [vmem:[%s2534_s3] ss:$0 sm:$0xff]  ;;  %s2067_s3 = smov 32   ;;  %v116_v37 = vld [vmem:[%s2531_s0 + $0x8] sm:$0xff] }
  0x17   :  { %1738 = vmatpush.msra.mxu3 %v108_v1  ;;  %166 = vmatpush.msra.mxu0 %v108_v1  ;;  %v117_v1 = vld [vmem:[%s2531_s0 + $0x10] sm:$0xff] }
  0x18   :  { %1690 = vmatmul.msk.f32.vlgmr.msra.gmra.mxu3 %vm126_vm0, %v122_v2  ;;  %1683 = vmatmul.msk.f32.vlgmr.msra.gmra.mxu0 %vm126_vm0, %v115_v4 }
  0x19   :  { %217 = vmatpush.msrb.mxu3 %v2175_v3  ;;  %285 = vmatpush.msra.mxu2 %v2186_v5 }
  0x1a   :  { %421 = vmatpush.msra.mxu1 %v2186_v5 }
  0x1b   :  { %218 = vmatpush.msrb.mxu3 %v2186_v5  ;;  %286 = vmatpush.msra.mxu2 %v2194_v6 }
  0x1c   :  { %422 = vmatpush.msra.mxu1 %v2194_v6 }
  0x1d   :  { %219 = vmatpush.msrb.mxu3 %v2194_v6  ;;  %287 = vmatpush.msra.mxu2 %v2202_v7 }
  0x1e   :  { %423 = vmatpush.msra.mxu1 %v2202_v7 }
  0x1f   :  { %488 = vmatpush.msrb.mxu2 %v2175_v3  ;;  %220 = vmatpush.msrb.mxu3 %v2202_v7 }
  0x20   :  { %624 = vmatpush.msrb.mxu1 %v2175_v3  ;;  %221 = vmatmul.f32.vlgmr.msrb.gmra.mxu3 %v2065_v8 }
  0x21   :  { %489 = vmatpush.msrb.mxu2 %v2186_v5  ;;  %352 = vmatpush.msra.mxu3 %v2175_v3 }
  0x22   :  { %625 = vmatpush.msrb.mxu1 %v2186_v5  ;;  %1684 = vmatmul.msk.f32.gmra.mxu0 %vm126_vm0, %v116_v37 }
  0x23   :  { %490 = vmatpush.msrb.mxu2 %v2194_v6  ;;  %353 = vmatpush.msra.mxu3 %v2186_v5 }
  0x24   :  { %626 = vmatpush.msrb.mxu1 %v2194_v6 }
  0x25   :  { %491 = vmatpush.msrb.mxu2 %v2202_v7  ;;  %354 = vmatpush.msra.mxu3 %v2194_v6 }
  0x26   :  { %627 = vmatpush.msrb.mxu1 %v2202_v7 }
  0x27   :  { %355 = vmatpush.msra.mxu3 %v2202_v7 }
  0x29   :  { %556 = vmatpush.msrb.mxu3 %v2175_v3 }
  0x2a   :  { %1685 = vmatmul.msk.f32.gmra.mxu0 %vm126_vm0, %v117_v1 }
  0x2b   :  { %557 = vmatpush.msrb.mxu3 %v2186_v5 }
  0x2d   :  { %558 = vmatpush.msrb.mxu3 %v2194_v6 }
  0x2f   :  { %559 = vmatpush.msrb.mxu3 %v2202_v7 }
  0x95   :  { %v168_v10 = vpop.f32.mrf.mxu0 }
  0x96   :  { %v169_v12 = vadd.f32 %v2231_v11, %v168_v10 }
  0x9b   :  { %v2226_v9 = vpop.f32.mrf.mxu3 }
  0x9f   :  { %v171_v39 = vpop.f32.mrf.mxu0 }
  0xa0   :  { %v172_v40 = vadd.f32 %v2231_v11, %v171_v39 }
  0xa3   :  { %v222_v13 = vpop.f32.mrf.mxu3 }
  0xa4   :  { %v225_v14 = vadd.f32 %v222_v13, %v169_v12 }
  0xa6   :  { %1770 = vtanh.f32 %v225_v14  ;;  %v1691_v16 = vmul.f32 -1.442695, %v225_v14 }
  0xa8   :  { %1772 = vpow2.f32 %v1691_v16 }
  0xac   :  { %v1771_v15 = vpop.eup %1770 }
  0xad   :  { %248 = vrot.lane.b32.xlu0 %v1771_v15, %s2066_s25 }
  0xae   :  { %v1773_v17 = vpop.eup %1772 }
  0xaf   :  { %v229_v18 = vadd.f32 1.0, %v1773_v17 }
  0xb1   :  { %1774 = vrcp.f32 %v229_v18  ;;  %v241_v24 = vand.u32 2147483648, %v229_v18  ;;  %vm235_vm2 = vweird.f32 %v229_v18  ;;  %v239_v25 = vand.u32 2147483647, %v229_v18 }
  0xb3   :  { %v242_v27 = vor.u32 1.1754944e-38, %v241_v24  ;;  %vm240_vm4 = vcmp.eq.f32.partialorder %v239_v25, 8.507059e+37 }
  0xb7   :  { %v1775_v19 = vpop.eup %1774 }
  0xb8   :  { %v231_v20 = vmul.f32 %v1775_v19, %v229_v18  ;;  %vm236_vm1 = vweird.f32 %v1775_v19 }
  0xb9   :  { %vm237_vm3 = vmor %vm235_vm2, %vm236_vm1 }
  0xba   :  { %v232_v21 = vsub.f32 1.0, %v231_v20 }
  0xbc   :  { %v233_v22 = vmul.f32 %v1775_v19, %v232_v21 }
  0xbe   :  { %v234_v23 = vadd.f32 %v1775_v19, %v233_v22 }
  0xc0   :  { %v238_v26 = vsel %vm237_vm3, %v1775_v19, %v234_v23 }
  0xc1   :  { %v243_v29 = vsel %vm240_vm4, %v242_v27, %v238_v26 }
  0xc2   :  { %v246_v31 = vmul.f32 0.0, %v243_v29 }
 0x11f   :  { %v249_v28 = vpop.permute.xlu0 %248 }
 0x120   :  { %v251_v30 = vmul.f32 %v249_v28, %v243_v29 }
 0x122   :  { %253 = vrot.lane.b32.xlu0 %v251_v30, %s2067_s3  ;;  %v118_v30 = vld [vmem:[%s2531_s0 + $0x18] sm:$0xff] }
 0x123   :  { %1686 = vmatmul.msk.f32.gmra.mxu0 %vm126_vm0, %v118_v30  ;;  %v745_v30 = vld [vmem:[%s2535_s4 + $0x8] sm:$0xff] }
 0x194   :  { %v254_v32 = vpop.permute.xlu0 %253 }
 0x195   :  { %v256_v33 = vadd.f32 %v254_v32, %v246_v31 }
 0x197   :  { %1776 = vtanh.f32 %v256_v33 }
 0x19d   :  { %v1777_v34 = vpop.eup %1776 }
 0x19e   :  { %259 = vrot.lane.b32.xlu1 %v1777_v34, %s2066_s25 }
 0x210   :  { %v260_v35 = vpop.permute.xlu1 %259 }
 0x211   :  { %v262_v36 = vmul.f32 %v260_v35, %v243_v29 }
 0x213   :  { %264 = vrot.lane.b32.xlu1 %v262_v36, %s2067_s3 }
 0x285   :  { %v265_v38 = vpop.permute.xlu1 %264 }
 0x286   :  { %267 = vst.msk [vmem:[#allocation2] sm:$0xff] %vm201_vm5, %v265_v38  ;;  %1692 = vmatmul.msk.f32.vlgmr.msra.gmra.mxu2 %vm201_vm5, %v265_v38 }
 0x287   :  { %692 = vmatpush.msra.mxu2 %v2175_v3  ;;  %v174_v3 = vpop.f32.mrf.mxu0 }
 0x288   :  { %v175_v4 = vadd.f32 %v2231_v11, %v174_v3 }
 0x289   :  { %693 = vmatpush.msra.mxu2 %v2186_v5 }
 0x28b   :  { %694 = vmatpush.msra.mxu2 %v2194_v6 }
 0x28d   :  { %695 = vmatpush.msra.mxu2 %v2202_v7 }
 0x28f   :  { %v177_v34 = vpop.f32.mrf.mxu0 }
 0x290   :  { %v178_v35 = vadd.f32 %v2231_v11, %v177_v34 }
 0x309   :  { %v289_v41 = vpop.f32.mrf.mxu2 }
 0x30a   :  { %v292_v42 = vadd.f32 %v289_v41, %v172_v40 }
 0x30c   :  { %1778 = vtanh.f32 %v292_v42  ;;  %v1693_v44 = vmul.f32 -1.442695, %v292_v42 }
 0x30e   :  { %1780 = vpow2.f32 %v1693_v44 }
 0x312   :  { %v1779_v43 = vpop.eup %1778 }
 0x313   :  { %315 = vrot.lane.b32.xlu2 %v1779_v43, %s2066_s25 }
 0x314   :  { %v1781_v45 = vpop.eup %1780 }
 0x315   :  { %v296_v46 = vadd.f32 1.0, %v1781_v45 }
 0x317   :  { %1782 = vrcp.f32 %v296_v46  ;;  %v308_v52 = vand.u32 2147483648, %v296_v46  ;;  %vm302_vm7 = vweird.f32 %v296_v46  ;;  %v306_v53 = vand.u32 2147483647, %v296_v46 }
 0x319   :  { %v309_v55 = vor.u32 1.1754944e-38, %v308_v52  ;;  %vm307_vm9 = vcmp.eq.f32.partialorder %v306_v53, 8.507059e+37 }
 0x31d   :  { %v1783_v47 = vpop.eup %1782 }
 0x31e   :  { %v298_v48 = vmul.f32 %v1783_v47, %v296_v46  ;;  %vm303_vm6 = vweird.f32 %v1783_v47 }
 0x31f   :  { %vm304_vm8 = vmor %vm302_vm7, %vm303_vm6 }
 0x320   :  { %v299_v49 = vsub.f32 1.0, %v298_v48 }
 0x322   :  { %v300_v50 = vmul.f32 %v1783_v47, %v299_v49 }
 0x324   :  { %v301_v51 = vadd.f32 %v1783_v47, %v300_v50 }
 0x326   :  { %v305_v54 = vsel %vm304_vm8, %v1783_v47, %v301_v51 }
 0x327   :  { %v310_v57 = vsel %vm307_vm9, %v309_v55, %v305_v54 }
 0x328   :  { %v313_v59 = vmul.f32 %v310_v57, %v256_v33 }
 0x36d   :  { %v316_v56 = vpop.permute.xlu2 %315 }
 0x36e   :  { %v318_v58 = vmul.f32 %v316_v56, %v310_v57 }
 0x370   :  { %320 = vrot.lane.b32.xlu2 %v318_v58, %s2067_s3 }
 0x3ca   :  { %v321_v60 = vpop.permute.xlu2 %320 }
 0x3cb   :  { %v323_v61 = vadd.f32 %v321_v60, %v313_v59  ;;  %v119_v60 = vld [vmem:[%s2531_s0 + $0x20] sm:$0xff] }
 0x3cc   :  { %1687 = vmatmul.msk.f32.gmra.mxu0 %vm126_vm0, %v119_v60 }
 0x3cd   :  { %1784 = vtanh.f32 %v323_v61 }
 0x3d3   :  { %v1785_v62 = vpop.eup %1784 }
 0x3d4   :  { %326 = vrot.lane.b32.xlu0 %v1785_v62, %s2066_s25 }
 0x446   :  { %v327_v63 = vpop.permute.xlu0 %326 }
 0x447   :  { %v329_v0 = vmul.f32 %v327_v63, %v310_v57 }
 0x449   :  { %331 = vrot.lane.b32.xlu1 %v329_v0, %s2067_s3  ;;  %v180_v62 = vpop.f32.mrf.mxu0 }
 0x44a   :  { %v181_v63 = vadd.f32 %v2231_v11, %v180_v62  ;;  %v121_v62 = vld [vmem:[%s2531_s0 + $0x30] sm:$0xff] }
 0x4bb   :  { %v332_v2 = vpop.permute.xlu1 %331 }
 0x4bc   :  { %335 = vst.msk [vmem:[#allocation2 + $0x8] sm:$0xff] %vm201_vm5, %v332_v2  ;;  %1694 = vmatmul.msk.f32.vlgmr.msra.gmra.mxu3 %vm201_vm5, %v332_v2 }
 0x4c3   :  { %v754_v34 = vld [vmem:[#allocation2 + $0x8] sm:$0xff] }
 0x53f   :  { %v357_v5 = vpop.f32.mrf.mxu3 }
 0x540   :  { %v360_v6 = vadd.f32 %v357_v5, %v175_v4 }
 0x542   :  { %1786 = vtanh.f32 %v360_v6  ;;  %v1695_v10 = vmul.f32 -1.442695, %v360_v6 }
 0x544   :  { %1788 = vpow2.f32 %v1695_v10 }
 0x548   :  { %v1787_v7 = vpop.eup %1786 }
 0x549   :  { %383 = vrot.lane.b32.xlu2 %v1787_v7, %s2066_s25 }
 0x54a   :  { %v1789_v12 = vpop.eup %1788 }
 0x54b   :  { %v364_v13 = vadd.f32 1.0, %v1789_v12 }
 0x54d   :  { %1790 = vrcp.f32 %v364_v13  ;;  %v376_v19 = vand.u32 2147483648, %v364_v13  ;;  %vm370_vm11 = vweird.f32 %v364_v13  ;;  %v374_v20 = vand.u32 2147483647, %v364_v13 }
 0x54f   :  { %v377_v22 = vor.u32 1.1754944e-38, %v376_v19  ;;  %vm375_vm13 = vcmp.eq.f32.partialorder %v374_v20, 8.507059e+37 }
 0x553   :  { %v1791_v14 = vpop.eup %1790 }
 0x554   :  { %v366_v15 = vmul.f32 %v1791_v14, %v364_v13  ;;  %vm371_vm10 = vweird.f32 %v1791_v14 }
 0x555   :  { %vm372_vm12 = vmor %vm370_vm11, %vm371_vm10 }
 0x556   :  { %v367_v16 = vsub.f32 1.0, %v366_v15 }
 0x558   :  { %v368_v17 = vmul.f32 %v1791_v14, %v367_v16 }
 0x55a   :  { %v369_v18 = vadd.f32 %v1791_v14, %v368_v17 }
 0x55c   :  { %v373_v21 = vsel %vm372_vm12, %v1791_v14, %v369_v18 }
 0x55d   :  { %v378_v24 = vsel %vm375_vm13, %v377_v22, %v373_v21 }
 0x55e   :  { %v381_v26 = vmul.f32 %v378_v24, %v323_v61 }
 0x5a3   :  { %v384_v23 = vpop.permute.xlu2 %383 }
 0x5a4   :  { %v386_v25 = vmul.f32 %v384_v23, %v378_v24 }
 0x5a6   :  { %388 = vrot.lane.b32.xlu0 %v386_v25, %s2067_s3 }
 0x618   :  { %v389_v27 = vpop.permute.xlu0 %388 }
 0x619   :  { %v391_v28 = vadd.f32 %v389_v27, %v381_v26  ;;  %v747_v27 = vld [vmem:[%s2535_s4 + $0x18] sm:$0xff] }
 0x61a   :  { %800 = vmatpush.msra.mxu3 %v747_v27 }
 0x61b   :  { %1792 = vtanh.f32 %v391_v28 }
 0x621   :  { %v1793_v29 = vpop.eup %1792 }
 0x622   :  { %394 = vrot.lane.b32.xlu1 %v1793_v29, %s2066_s25  ;;  %v120_v29 = vld [vmem:[%s2531_s0 + $0x28] sm:$0xff] }
 0x623   :  { %1688 = vmatmul.msk.f32.gmra.mxu0 %vm126_vm0, %v120_v29 }
 0x62b   :  { %1689 = vmatmul.msk.f32.gmra.mxu0 %vm126_vm0, %v121_v62 }
 0x694   :  { %v395_v31 = vpop.permute.xlu1 %394 }
 0x695   :  { %v397_v32 = vmul.f32 %v395_v31, %v378_v24  ;;  %v744_v31 = vld [vmem:[%s2535_s4] sm:$0xff] }
 0x697   :  { %399 = vrot.lane.b32.xlu2 %v397_v32, %s2067_s3 }
 0x6f1   :  { %v400_v33 = vpop.permute.xlu2 %399 }
 0x6f2   :  { %403 = vst.msk [vmem:[#allocation2 + $0x10] sm:$0xff] %vm201_vm5, %v400_v33  ;;  %1696 = vmatmul.msk.f32.vlgmr.msra.gmra.mxu1 %vm201_vm5, %v400_v33  ;;  %v753_v33 = vld [vmem:[#allocation2] sm:$0xff] }
 0x76f   :  { %v425_v36 = vpop.f32.mrf.mxu1 }
 0x770   :  { %v428_v37 = vadd.f32 %v425_v36, %v178_v35  ;;  %v755_v35 = vld [vmem:[#allocation2 + $0x10] sm:$0xff] }
 0x772   :  { %1794 = vtanh.f32 %v428_v37  ;;  %v1697_v39 = vmul.f32 -1.442695, %v428_v37 }
 0x774   :  { %1796 = vpow2.f32 %v1697_v39 }
 0x778   :  { %v1795_v38 = vpop.eup %1794 }
 0x779   :  { %451 = vrot.lane.b32.xlu0 %v1795_v38, %s2066_s25  ;;  %v183_v38 = vpop.f32.mrf.mxu0 }
 0x77a   :  { %v1797_v40 = vpop.eup %1796  ;;  %v184_v39 = vadd.f32 %v2231_v11, %v183_v38 }
 0x77b   :  { %v432_v41 = vadd.f32 1.0, %v1797_v40 }
 0x77d   :  { %1798 = vrcp.f32 %v432_v41  ;;  %v444_v47 = vand.u32 2147483648, %v432_v41  ;;  %vm438_vm15 = vweird.f32 %v432_v41  ;;  %v442_v48 = vand.u32 2147483647, %v432_v41 }
 0x77f   :  { %v445_v50 = vor.u32 1.1754944e-38, %v444_v47  ;;  %vm443_vm2 = vcmp.eq.f32.partialorder %v442_v48, 8.507059e+37 }
 0x783   :  { %v1799_v42 = vpop.eup %1798 }
 0x784   :  { %v434_v43 = vmul.f32 %v1799_v42, %v432_v41  ;;  %vm439_vm14 = vweird.f32 %v1799_v42 }
 0x785   :  { %vm440_vm1 = vmor %vm438_vm15, %vm439_vm14 }
 0x786   :  { %v435_v44 = vsub.f32 1.0, %v434_v43 }
 0x788   :  { %v436_v45 = vmul.f32 %v1799_v42, %v435_v44 }
 0x78a   :  { %v437_v46 = vadd.f32 %v1799_v42, %v436_v45 }
 0x78c   :  { %v441_v49 = vsel %vm440_vm1, %v1799_v42, %v437_v46 }
 0x78d   :  { %v446_v52 = vsel %vm443_vm2, %v445_v50, %v441_v49 }
 0x78e   :  { %v449_v54 = vmul.f32 %v446_v52, %v391_v28  ;;  %v746_v28 = vld [vmem:[%s2535_s4 + $0x10] sm:$0xff] }
 0x78f   :  { %801 = vmatpush.msra.mxu3 %v746_v28 }
 0x791   :  { %802 = vmatpush.msra.mxu3 %v745_v30 }
 0x793   :  { %803 = vmatpush.msra.mxu3 %v744_v31 }
 0x7eb   :  { %v452_v51 = vpop.permute.xlu0 %451 }
 0x7ec   :  { %v454_v53 = vmul.f32 %v452_v51, %v446_v52 }
 0x7ee   :  { %456 = vrot.lane.b32.xlu1 %v454_v53, %s2067_s3 }
 0x860   :  { %v457_v55 = vpop.permute.xlu1 %456 }
 0x861   :  { %v459_v56 = vadd.f32 %v457_v55, %v449_v54 }
 0x863   :  { %1800 = vtanh.f32 %v459_v56 }
 0x869   :  { %v1801_v57 = vpop.eup %1800 }
 0x86a   :  { %462 = vrot.lane.b32.xlu2 %v1801_v57, %s2066_s25 }
 0x8c4   :  { %v463_v58 = vpop.permute.xlu2 %462 }
 0x8c5   :  { %v465_v59 = vmul.f32 %v463_v58, %v446_v52 }
 0x8c7   :  { %467 = vrot.lane.b32.xlu0 %v465_v59, %s2067_s3 }
 0x939   :  { %v468_v61 = vpop.permute.xlu0 %467 }
 0x93a   :  { %471 = vst.msk [vmem:[#allocation2 + $0x18] sm:$0xff] %vm201_vm5, %v468_v61  ;;  %1698 = vmatmul.msk.f32.vlgmr.msrb.gmra.mxu2 %vm201_vm5, %v468_v61 }
 0x941   :  { %v756_v36 = vld [vmem:[#allocation2 + $0x18] sm:$0xff] }
 0x9bd   :  { %v493_v0 = vpop.f32.mrf.mxu2 }
 0x9be   :  { %v496_v1 = vadd.f32 %v493_v0, %v181_v63 }
 0x9c0   :  { %1802 = vtanh.f32 %v496_v1  ;;  %v1699_v3 = vmul.f32 -1.442695, %v496_v1  ;;  %v2321_v1 = vld [vmem:[#allocation4 + $0x18] sm:$0xff] }
 0x9c1   :  { %850 = vmatpush.msra.mxu1 %v2321_v1  ;;  %916 = vmatpush.msrb.mxu2 %v2321_v1 }
 0x9c2   :  { %1804 = vpow2.f32 %v1699_v3  ;;  %v2327_v3 = vld [vmem:[#allocation4 + $0x8] sm:$0xff] }
 0x9c6   :  { %v1803_v2 = vpop.eup %1802 }
 0x9c7   :  { %519 = vrot.lane.b32.xlu1 %v1803_v2, %s2066_s25  ;;  %v2323_v2 = vld [vmem:[#allocation4 + $0x10] sm:$0xff] }
 0x9c8   :  { %v1805_v4 = vpop.eup %1804  ;;  %851 = vmatpush.msra.mxu1 %v2323_v2  ;;  %917 = vmatpush.msrb.mxu2 %v2323_v2 }
 0x9c9   :  { %v500_v5 = vadd.f32 1.0, %v1805_v4  ;;  %v2331_v4 = vld [vmem:[#allocation4] sm:$0xff] }
 0x9ca   :  { %852 = vmatpush.msra.mxu1 %v2327_v3  ;;  %918 = vmatpush.msrb.mxu2 %v2327_v3 }
 0x9cb   :  { %1806 = vrcp.f32 %v500_v5  ;;  %v512_v14 = vand.u32 2147483648, %v500_v5  ;;  %vm506_vm4 = vweird.f32 %v500_v5  ;;  %v510_v15 = vand.u32 2147483647, %v500_v5 }
 0x9cc   :  { %853 = vmatpush.msra.mxu1 %v2331_v4  ;;  %919 = vmatpush.msrb.mxu2 %v2331_v4 }
 0x9cd   :  { %v513_v17 = vor.u32 1.1754944e-38, %v512_v14  ;;  %vm511_vm7 = vcmp.eq.f32.partialorder %v510_v15, 8.507059e+37  ;;  %v2353_v14 = vld [vmem:[%s2537_s6] ss:$0 sm:$0xff] }
 0x9d1   :  { %v1807_v6 = vpop.eup %1806 }
 0x9d2   :  { %v502_v7 = vmul.f32 %v1807_v6, %v500_v5  ;;  %vm507_vm3 = vweird.f32 %v1807_v6 }
 0x9d3   :  { %vm508_vm6 = vmor %vm506_vm4, %vm507_vm3 }
 0x9d4   :  { %v503_v10 = vsub.f32 1.0, %v502_v7  ;;  %v186_v7 = vpop.f32.mrf.mxu0 }
 0x9d6   :  { %v504_v12 = vmul.f32 %v1807_v6, %v503_v10  ;;  %v187_v10 = vadd.f32 %v2231_v11, %v186_v7 }
 0x9d8   :  { %v505_v13 = vadd.f32 %v1807_v6, %v504_v12 }
 0x9da   :  { %v509_v16 = vsel %vm508_vm6, %v1807_v6, %v505_v13 }
 0x9db   :  { %v514_v19 = vsel %vm511_vm7, %v513_v17, %v509_v16 }
 0x9dc   :  { %v517_v21 = vmul.f32 %v514_v19, %v459_v56 }
 0xa39   :  { %v520_v18 = vpop.permute.xlu1 %519 }
 0xa3a   :  { %v522_v20 = vmul.f32 %v520_v18, %v514_v19 }
 0xa3c   :  { %524 = vrot.lane.b32.xlu2 %v522_v20, %s2067_s3 }
 0xa96   :  { %v525_v22 = vpop.permute.xlu2 %524 }
 0xa97   :  { %v527_v23 = vadd.f32 %v525_v22, %v517_v21 }
 0xa99   :  { %1808 = vtanh.f32 %v527_v23 }
 0xa9f   :  { %v1809_v24 = vpop.eup %1808 }
 0xaa0   :  { %530 = vrot.lane.b32.xlu0 %v1809_v24, %s2066_s25 }
 0xb12   :  { %v531_v25 = vpop.permute.xlu0 %530 }
 0xb13   :  { %v533_v26 = vmul.f32 %v531_v25, %v514_v19 }
 0xb15   :  { %535 = vrot.lane.b32.xlu1 %v533_v26, %s2067_s3 }
 0xb87   :  { %v536_v32 = vpop.permute.xlu1 %535 }
 0xb88   :  { %539 = vst.msk [vmem:[#allocation2 + $0x20] sm:$0xff] %vm201_vm5, %v536_v32  ;;  %1700 = vmatmul.msk.f32.vlgmr.msrb.gmra.mxu3 %vm201_vm5, %v536_v32 }
 0xb8f   :  { %v757_v37 = vld [vmem:[#allocation2 + $0x20] sm:$0xff] }
 0xb90   :  { %1706 = vmatmul.msk.f32.vlgmr.msra.gmra.mxu3 %vm201_vm5, %v753_v33 }
 0xb98   :  { %1707 = vmatmul.msk.f32.gmra.mxu3 %vm201_vm5, %v754_v34 }
 0xba0   :  { %1708 = vmatmul.msk.f32.gmra.mxu3 %vm201_vm5, %v755_v35 }
 0xba8   :  { %1709 = vmatmul.msk.f32.gmra.mxu3 %vm201_vm5, %v756_v36 }
 0xbb0   :  { %1710 = vmatmul.msk.f32.gmra.mxu3 %vm201_vm5, %v757_v37 }
 0xc0b   :  { %v561_v40 = vpop.f32.mrf.mxu3 }
 0xc0c   :  { %v564_v41 = vadd.f32 %v561_v40, %v184_v39 }
 0xc0e   :  { %1810 = vtanh.f32 %v564_v41  ;;  %v1701_v43 = vmul.f32 -1.442695, %v564_v41 }
 0xc10   :  { %1812 = vpow2.f32 %v1701_v43 }
 0xc14   :  { %v1811_v42 = vpop.eup %1810 }
 0xc15   :  { %587 = vrot.lane.b32.xlu2 %v1811_v42, %s2066_s25 }
 0xc16   :  { %v1813_v44 = vpop.eup %1812 }
 0xc17   :  { %v568_v45 = vadd.f32 1.0, %v1813_v44 }
 0xc19   :  { %1814 = vrcp.f32 %v568_v45  ;;  %v580_v51 = vand.u32 2147483648, %v568_v45  ;;  %vm574_vm9 = vweird.f32 %v568_v45  ;;  %v578_v52 = vand.u32 2147483647, %v568_v45 }
 0xc1b   :  { %v581_v54 = vor.u32 1.1754944e-38, %v580_v51  ;;  %vm579_vm11 = vcmp.eq.f32.partialorder %v578_v52, 8.507059e+37 }
 0xc1f   :  { %v1815_v46 = vpop.eup %1814 }
 0xc20   :  { %v570_v47 = vmul.f32 %v1815_v46, %v568_v45  ;;  %vm575_vm8 = vweird.f32 %v1815_v46 }
 0xc21   :  { %vm576_vm10 = vmor %vm574_vm9, %vm575_vm8 }
 0xc22   :  { %v571_v48 = vsub.f32 1.0, %v570_v47 }
 0xc24   :  { %v572_v49 = vmul.f32 %v1815_v46, %v571_v48 }
 0xc26   :  { %v573_v50 = vadd.f32 %v1815_v46, %v572_v49 }
 0xc28   :  { %v577_v53 = vsel %vm576_vm10, %v1815_v46, %v573_v50 }
 0xc29   :  { %v582_v56 = vsel %vm579_vm11, %v581_v54, %v577_v53 }
 0xc2a   :  { %v585_v58 = vmul.f32 %v582_v56, %v527_v23 }
 0xc6f   :  { %v588_v55 = vpop.permute.xlu2 %587 }
 0xc70   :  { %v590_v57 = vmul.f32 %v588_v55, %v582_v56 }
 0xc72   :  { %592 = vrot.lane.b32.xlu0 %v590_v57, %s2067_s3 }
 0xce4   :  { %v593_v59 = vpop.permute.xlu0 %592 }
 0xce5   :  { %v2312_v60 = vadd.f32 %v593_v59, %v585_v58 }
 0xce7   :  { %1816 = vtanh.f32 %v2312_v60 }
 0xced   :  { %v1817_v61 = vpop.eup %1816 }
 0xcee   :  { %598 = vrot.lane.b32.xlu1 %v1817_v61, %s2066_s25 }
 0xd60   :  { %v599_v63 = vpop.permute.xlu1 %598 }
 0xd61   :  { %v601_v0 = vmul.f32 %v599_v63, %v582_v56 }
 0xd63   :  { %603 = vrot.lane.b32.xlu2 %v601_v0, %s2067_s3 }
 0xdbd   :  { %v604_v5 = vpop.permute.xlu2 %603 }
 0xdbe   :  { %607 = vst.msk [vmem:[#allocation2 + $0x28] sm:$0xff] %vm201_vm5, %v604_v5  ;;  %1702 = vmatmul.msk.f32.vlgmr.msrb.gmra.mxu1 %vm201_vm5, %v604_v5  ;;  %v190_v5 = vadd.f32 %v2231_v11, %v2226_v9 }
 0xdbf   :  { %982 = vmatpush.msrb.mxu1 %v2321_v1 }
 0xdc1   :  { %983 = vmatpush.msrb.mxu1 %v2323_v2 }
 0xdc3   :  { %984 = vmatpush.msrb.mxu1 %v2327_v3 }
 0xdc5   :  { %v758_v6 = vld [vmem:[#allocation2 + $0x28] sm:$0xff]  ;;  %985 = vmatpush.msrb.mxu1 %v2331_v4 }
 0xdc6   :  { %1711 = vmatmul.msk.f32.gmra.mxu3 %vm201_vm5, %v758_v6  ;;  %854 = vmatmul.f32.vlgmr.msra.gmra.mxu1 %v2065_v8  ;;  %v805_v8 = vpop.f32.mrf.mxu3 }
 0xdc7   :  { %1114 = vmatpush.msra.mxu1 %v2321_v1  ;;  %v806_v15 = vadd.f32 %v2353_v14, %v805_v8 }
 0xdc9   :  { %1115 = vmatpush.msra.mxu1 %v2323_v2 }
 0xdcb   :  { %1116 = vmatpush.msra.mxu1 %v2327_v3 }
 0xdcd   :  { %1117 = vmatpush.msra.mxu1 %v2331_v4 }
 0xe3b   :  { %v629_v12 = vpop.f32.mrf.mxu1 }
 0xe3c   :  { %v632_v13 = vadd.f32 %v629_v12, %v187_v10  ;;  %v808_v10 = vpop.f32.mrf.mxu3 }
 0xe3d   :  { %v809_v12 = vadd.f32 %v2353_v14, %v808_v10 }
 0xe3e   :  { %1818 = vtanh.f32 %v632_v13  ;;  %v1703_v20 = vmul.f32 -1.442695, %v632_v13 }
 0xe43   :  { %v855_v16 = vpop.f32.mrf.mxu1 }
 0xe44   :  { %v1819_v17 = vpop.eup %1818  ;;  %v858_v18 = vadd.f32 %v855_v16, %v806_v15 }
 0xe45   :  { %655 = vrot.lane.b32.xlu0 %v1819_v17, %s2066_s25 }
 0xe46   :  { %1820 = vtanh.f32 %v858_v18  ;;  %v1714_v21 = vmul.f32 -1.442695, %v858_v18 }
 0xe47   :  { %1822 = vpow2.f32 %v1703_v20 }
 0xe48   :  { %1824 = vpow2.f32 %v1714_v21 }
 0xe4c   :  { %v1821_v19 = vpop.eup %1820 }
 0xe4d   :  { %881 = vrot.lane.b32.xlu1 %v1821_v19, %s2066_s25  ;;  %v1823_v22 = vpop.eup %1822 }
 0xe4e   :  { %v636_v23 = vadd.f32 1.0, %v1823_v22  ;;  %v1825_v24 = vpop.eup %1824 }
 0xe4f   :  { %v862_v25 = vadd.f32 1.0, %v1825_v24 }
 0xe50   :  { %1826 = vrcp.f32 %v636_v23  ;;  %v648_v34 = vand.u32 2147483648, %v636_v23  ;;  %vm642_vm12 = vweird.f32 %v636_v23  ;;  %v646_v35 = vand.u32 2147483647, %v636_v23 }
 0xe51   :  { %1828 = vrcp.f32 %v862_v25  ;;  %v874_v43 = vand.u32 2147483648, %v862_v25  ;;  %vm868_vm1 = vweird.f32 %v862_v25  ;;  %v872_v44 = vand.u32 2147483647, %v862_v25 }
 0xe52   :  { %v649_v38 = vor.u32 1.1754944e-38, %v648_v34  ;;  %vm647_vm14 = vcmp.eq.f32.partialorder %v646_v35, 8.507059e+37 }
 0xe53   :  { %v875_v46 = vor.u32 1.1754944e-38, %v874_v43  ;;  %vm873_vm3 = vcmp.eq.f32.partialorder %v872_v44, 8.507059e+37 }
 0xe56   :  { %v1827_v26 = vpop.eup %1826 }
 0xe57   :  { %v638_v27 = vmul.f32 %v1827_v26, %v636_v23  ;;  %v1829_v29 = vpop.eup %1828  ;;  %vm643_vm0 = vweird.f32 %v1827_v26 }
 0xe58   :  { %v864_v31 = vmul.f32 %v1829_v29, %v862_v25  ;;  %vm644_vm13 = vmor %vm642_vm12, %vm643_vm0  ;;  %vm869_vm15 = vweird.f32 %v1829_v29 }
 0xe59   :  { %v639_v28 = vsub.f32 1.0, %v638_v27  ;;  %vm870_vm2 = vmor %vm868_vm1, %vm869_vm15 }
 0xe5a   :  { %v865_v33 = vsub.f32 1.0, %v864_v31 }
 0xe5b   :  { %v640_v30 = vmul.f32 %v1827_v26, %v639_v28 }
 0xe5c   :  { %v866_v37 = vmul.f32 %v1829_v29, %v865_v33 }
 0xe5d   :  { %v641_v32 = vadd.f32 %v1827_v26, %v640_v30 }
 0xe5e   :  { %v867_v42 = vadd.f32 %v1829_v29, %v866_v37 }
 0xe5f   :  { %v645_v36 = vsel %vm644_vm13, %v1827_v26, %v641_v32 }
 0xe60   :  { %v650_v40 = vsel %vm647_vm14, %v649_v38, %v645_v36  ;;  %v871_v45 = vsel %vm870_vm2, %v1829_v29, %v867_v42  ;;  %v811_v36 = vpop.f32.mrf.mxu3 }
 0xe61   :  { %v876_v48 = vsel %vm873_vm3, %v875_v46, %v871_v45  ;;  %v653_v50 = vmul.f32 %v650_v40, %v2312_v60  ;;  %v812_v37 = vadd.f32 %v2353_v14, %v811_v36 }
 0xe62   :  { %v879_v54 = vmul.f32 0.0, %v876_v48 }
 0xeb7   :  { %v656_v39 = vpop.permute.xlu0 %655 }
 0xeb8   :  { %v658_v41 = vmul.f32 %v656_v39, %v650_v40 }
 0xeba   :  { %660 = vrot.lane.b32.xlu2 %v658_v41, %s2067_s3 }
 0xebf   :  { %v882_v47 = vpop.permute.xlu1 %881 }
 0xec0   :  { %v884_v49 = vmul.f32 %v882_v47, %v876_v48 }
 0xec2   :  { %886 = vrot.lane.b32.xlu0 %v884_v49, %s2067_s3 }
 0xf14   :  { %v661_v51 = vpop.permute.xlu2 %660 }
 0xf15   :  { %v2361_v52 = vadd.f32 %v661_v51, %v653_v50 }
 0xf17   :  { %1830 = vtanh.f32 %v2361_v52 }
 0xf1d   :  { %v1831_v53 = vpop.eup %1830 }
 0xf1e   :  { %666 = vrot.lane.b32.xlu1 %v1831_v53, %s2066_s25 }
 0xf34   :  { %v887_v55 = vpop.permute.xlu0 %886 }
 0xf35   :  { %v889_v56 = vadd.f32 %v887_v55, %v879_v54 }
 0xf37   :  { %1832 = vtanh.f32 %v889_v56 }
 0xf3d   :  { %v1833_v57 = vpop.eup %1832 }
 0xf3e   :  { %892 = vrot.lane.b32.xlu2 %v1833_v57, %s2066_s25 }
 0xf90   :  { %v667_v58 = vpop.permute.xlu1 %666 }
 0xf91   :  { %v669_v59 = vmul.f32 %v667_v58, %v650_v40 }
 0xf93   :  { %671 = vrot.lane.b32.xlu0 %v669_v59, %s2067_s3 }
 0xf98   :  { %v893_v60 = vpop.permute.xlu2 %892 }
 0xf99   :  { %v895_v61 = vmul.f32 %v893_v60, %v876_v48 }
 0xf9b   :  { %897 = vrot.lane.b32.xlu1 %v895_v61, %s2067_s3 }
0x1005   :  { %v672_v62 = vpop.permute.xlu0 %671 }
0x1006   :  { %675 = vst.msk [vmem:[#allocation2 + $0x30] sm:$0xff] %vm201_vm5, %v672_v62  ;;  %1704 = vmatmul.msk.f32.vlgmr.msra.gmra.mxu2 %vm201_vm5, %v672_v62 }
0x1007   :  { %1048 = vmatpush.msra.mxu2 %v2321_v1 }
0x1009   :  { %1049 = vmatpush.msra.mxu2 %v2323_v2 }
0x100b   :  { %1050 = vmatpush.msra.mxu2 %v2327_v3 }
0x100d   :  { %v898_v63 = vpop.permute.xlu1 %897  ;;  %v759_v0 = vld [vmem:[#allocation2 + $0x30] sm:$0xff]  ;;  %1051 = vmatpush.msra.mxu2 %v2331_v4 }
0x100e   :  { %900 = vst.msk [vmem:[#allocation2] sm:$0xff] %vm201_vm5, %v898_v63  ;;  %1712 = vmatmul.msk.f32.gmra.mxu3 %vm201_vm5, %v759_v0  ;;  %1715 = vmatmul.msk.f32.vlgmr.msrb.gmra.mxu2 %vm201_vm5, %v898_v63  ;;  %v814_v0 = vpop.f32.mrf.mxu3 }
0x100f   :  { %1180 = vmatpush.msrb.mxu2 %v2321_v1 }
0x1011   :  { %1181 = vmatpush.msrb.mxu2 %v2323_v2 }
0x1013   :  { %1182 = vmatpush.msrb.mxu2 %v2327_v3 }
0x1015   :  { %1183 = vmatpush.msrb.mxu2 %v2331_v4 }
0x1089   :  { %v697_v6 = vpop.f32.mrf.mxu2 }
0x108a   :  { %v2383_v7 = vadd.f32 %v697_v6, %v190_v5  ;;  %v815_v5 = vadd.f32 %v2353_v14, %v814_v0 }
0x1091   :  { %v921_v13 = vpop.f32.mrf.mxu2 }
0x1092   :  { %v924_v8 = vadd.f32 %v921_v13, %v809_v12 }
0x1094   :  { %1834 = vtanh.f32 %v924_v8  ;;  %v1716_v16 = vmul.f32 -1.442695, %v924_v8 }
0x1096   :  { %1836 = vpow2.f32 %v1716_v16 }
0x109a   :  { %v1835_v15 = vpop.eup %1834 }
0x109b   :  { %947 = vrot.lane.b32.xlu2 %v1835_v15, %s2066_s25 }
0x109c   :  { %v1837_v17 = vpop.eup %1836 }
0x109d   :  { %v928_v18 = vadd.f32 1.0, %v1837_v17 }
0x109f   :  { %1838 = vrcp.f32 %v928_v18  ;;  %v940_v22 = vand.u32 2147483648, %v928_v18  ;;  %vm934_vm6 = vweird.f32 %v928_v18  ;;  %v938_v23 = vand.u32 2147483647, %v928_v18 }
0x10a1   :  { %v941_v25 = vor.u32 1.1754944e-38, %v940_v22  ;;  %vm939_vm8 = vcmp.eq.f32.partialorder %v938_v23, 8.507059e+37 }
0x10a5   :  { %v1839_v19 = vpop.eup %1838 }
0x10a6   :  { %v930_v20 = vmul.f32 %v1839_v19, %v928_v18  ;;  %vm935_vm4 = vweird.f32 %v1839_v19 }
0x10a7   :  { %vm936_vm7 = vmor %vm934_vm6, %vm935_vm4 }
0x10a8   :  { %v931_v9 = vsub.f32 1.0, %v930_v20 }
0x10aa   :  { %v932_v11 = vmul.f32 %v1839_v19, %v931_v9 }
0x10ac   :  { %v933_v21 = vadd.f32 %v1839_v19, %v932_v11 }
0x10ae   :  { %v937_v24 = vsel %vm936_vm7, %v1839_v19, %v933_v21 }
0x10af   :  { %v942_v27 = vsel %vm939_vm8, %v941_v25, %v937_v24 }
0x10b0   :  { %v945_v29 = vmul.f32 %v942_v27, %v889_v56 }
0x10f5   :  { %v948_v26 = vpop.permute.xlu2 %947 }
0x10f6   :  { %v950_v28 = vmul.f32 %v948_v26, %v942_v27 }
0x10f8   :  { %952 = vrot.lane.b32.xlu0 %v950_v28, %s2067_s3 }
0x116a   :  { %v953_v30 = vpop.permute.xlu0 %952 }
0x116b   :  { %v955_v31 = vadd.f32 %v953_v30, %v945_v29  ;;  %v817_v29 = vpop.f32.mrf.mxu3 }
0x116c   :  { %v818_v30 = vadd.f32 %v2353_v14, %v817_v29 }
0x116d   :  { %1840 = vtanh.f32 %v955_v31 }
0x1173   :  { %v1841_v32 = vpop.eup %1840 }
0x1174   :  { %958 = vrot.lane.b32.xlu1 %v1841_v32, %s2066_s25 }
0x11e6   :  { %v959_v33 = vpop.permute.xlu1 %958 }
0x11e7   :  { %v961_v34 = vmul.f32 %v959_v33, %v942_v27 }
0x11e9   :  { %963 = vrot.lane.b32.xlu2 %v961_v34, %s2067_s3 }
0x1243   :  { %v964_v35 = vpop.permute.xlu2 %963 }
0x1244   :  { %966 = vst.msk [vmem:[#allocation2 + $0x8] sm:$0xff] %vm201_vm5, %v964_v35  ;;  %1717 = vmatmul.msk.f32.vlgmr.msrb.gmra.mxu1 %vm201_vm5, %v964_v35 }
0x1245   :  { %1246 = vmatpush.msrb.mxu1 %v2321_v1 }
0x1247   :  { %1247 = vmatpush.msrb.mxu1 %v2323_v2 }
0x1249   :  { %1248 = vmatpush.msrb.mxu1 %v2327_v3 }
0x124b   :  { %1249 = vmatpush.msrb.mxu1 %v2331_v4 }
0x12c1   :  { %v987_v38 = vpop.f32.mrf.mxu1 }
0x12c2   :  { %v990_v39 = vadd.f32 %v987_v38, %v812_v37 }
0x12c4   :  { %1842 = vtanh.f32 %v990_v39  ;;  %v1718_v41 = vmul.f32 -1.442695, %v990_v39 }
0x12c6   :  { %1844 = vpow2.f32 %v1718_v41 }
0x12ca   :  { %v1843_v40 = vpop.eup %1842 }
0x12cb   :  { %1013 = vrot.lane.b32.xlu0 %v1843_v40, %s2066_s25 }
0x12cc   :  { %v1845_v42 = vpop.eup %1844 }
0x12cd   :  { %v994_v43 = vadd.f32 1.0, %v1845_v42 }
0x12cf   :  { %1846 = vrcp.f32 %v994_v43  ;;  %v1006_v49 = vand.u32 2147483648, %v994_v43  ;;  %vm1000_vm10 = vweird.f32 %v994_v43  ;;  %v1004_v50 = vand.u32 2147483647, %v994_v43 }
0x12d1   :  { %v1007_v53 = vor.u32 1.1754944e-38, %v1006_v49  ;;  %vm1005_vm0 = vcmp.eq.f32.partialorder %v1004_v50, 8.507059e+37 }
0x12d5   :  { %v1847_v44 = vpop.eup %1846 }
0x12d6   :  { %v996_v45 = vmul.f32 %v1847_v44, %v994_v43  ;;  %vm1001_vm9 = vweird.f32 %v1847_v44 }
0x12d7   :  { %vm1002_vm11 = vmor %vm1000_vm10, %vm1001_vm9 }
0x12d8   :  { %v997_v46 = vsub.f32 1.0, %v996_v45 }
0x12da   :  { %v998_v47 = vmul.f32 %v1847_v44, %v997_v46 }
0x12dc   :  { %v999_v48 = vadd.f32 %v1847_v44, %v998_v47 }
0x12de   :  { %v1003_v51 = vsel %vm1002_vm11, %v1847_v44, %v999_v48 }
0x12df   :  { %v1008_v55 = vsel %vm1005_vm0, %v1007_v53, %v1003_v51 }
0x12e0   :  { %v1011_v57 = vmul.f32 %v1008_v55, %v955_v31 }
0x133d   :  { %v1014_v54 = vpop.permute.xlu0 %1013 }
0x133e   :  { %v1016_v56 = vmul.f32 %v1014_v54, %v1008_v55 }
0x1340   :  { %1018 = vrot.lane.b32.xlu1 %v1016_v56, %s2067_s3 }
0x13b2   :  { %v1019_v58 = vpop.permute.xlu1 %1018 }
0x13b3   :  { %v1021_v59 = vadd.f32 %v1019_v58, %v1011_v57  ;;  %v820_v57 = vpop.f32.mrf.mxu3 }
0x13b4   :  { %v821_v58 = vadd.f32 %v2353_v14, %v820_v57  ;;  %v1458_v57 = vld [vmem:[#allocation9 + $0x30] sm:$0xff] }
0x13b5   :  { %1848 = vtanh.f32 %v1021_v59 }
0x13bb   :  { %v1849_v60 = vpop.eup %1848 }
0x13bc   :  { %1024 = vrot.lane.b32.xlu2 %v1849_v60, %s2066_s25 }
0x1416   :  { %v1025_v61 = vpop.permute.xlu2 %1024 }
0x1417   :  { %v1027_v62 = vmul.f32 %v1025_v61, %v1008_v55 }
0x1419   :  { %1029 = vrot.lane.b32.xlu0 %v1027_v62, %s2067_s3 }
0x148b   :  { %v1030_v63 = vpop.permute.xlu0 %1029 }
0x148c   :  { %1032 = vst.msk [vmem:[#allocation2 + $0x10] sm:$0xff] %vm201_vm5, %v1030_v63  ;;  %1719 = vmatmul.msk.f32.vlgmr.msra.gmra.mxu2 %vm201_vm5, %v1030_v63 }
0x148d   :  { %1312 = vmatpush.msra.mxu2 %v2321_v1 }
0x148f   :  { %1313 = vmatpush.msra.mxu2 %v2323_v2 }
0x1491   :  { %1314 = vmatpush.msra.mxu2 %v2327_v3 }
0x1493   :  { %1315 = vmatpush.msra.mxu2 %v2331_v4 }
0x150f   :  { %v1053_v6 = vpop.f32.mrf.mxu2 }
0x1510   :  { %v1056_v10 = vadd.f32 %v1053_v6, %v815_v5 }
0x1512   :  { %1850 = vtanh.f32 %v1056_v10  ;;  %v1720_v13 = vmul.f32 -1.442695, %v1056_v10 }
0x1514   :  { %1852 = vpow2.f32 %v1720_v13 }
0x1518   :  { %v1851_v12 = vpop.eup %1850 }
0x1519   :  { %1079 = vrot.lane.b32.xlu1 %v1851_v12, %s2066_s25 }
0x151a   :  { %v1853_v8 = vpop.eup %1852 }
0x151b   :  { %v1060_v15 = vadd.f32 1.0, %v1853_v8 }
0x151d   :  { %1854 = vrcp.f32 %v1060_v15  ;;  %v1072_v4 = vand.u32 2147483648, %v1060_v15  ;;  %vm1066_vm13 = vweird.f32 %v1060_v15  ;;  %v1070_v18 = vand.u32 2147483647, %v1060_v15 }
0x151f   :  { %v1073_v20 = vor.u32 1.1754944e-38, %v1072_v4  ;;  %vm1071_vm15 = vcmp.eq.f32.partialorder %v1070_v18, 8.507059e+37 }
0x1523   :  { %v1855_v1 = vpop.eup %1854 }
0x1524   :  { %v1062_v2 = vmul.f32 %v1855_v1, %v1060_v15  ;;  %vm1067_vm12 = vweird.f32 %v1855_v1 }
0x1525   :  { %vm1068_vm14 = vmor %vm1066_vm13, %vm1067_vm12 }
0x1526   :  { %v1063_v16 = vsub.f32 1.0, %v1062_v2 }
0x1528   :  { %v1064_v3 = vmul.f32 %v1855_v1, %v1063_v16 }
0x152a   :  { %v1065_v17 = vadd.f32 %v1855_v1, %v1064_v3 }
0x152c   :  { %v1069_v19 = vsel %vm1068_vm14, %v1855_v1, %v1065_v17 }
0x152d   :  { %v1074_v11 = vsel %vm1071_vm15, %v1073_v20, %v1069_v19 }
0x152e   :  { %v1077_v22 = vmul.f32 %v1074_v11, %v1021_v59 }
0x158b   :  { %v1080_v9 = vpop.permute.xlu1 %1079 }
0x158c   :  { %v1082_v21 = vmul.f32 %v1080_v9, %v1074_v11 }
0x158e   :  { %1084 = vrot.lane.b32.xlu2 %v1082_v21, %s2067_s3 }
0x15e8   :  { %v1085_v23 = vpop.permute.xlu2 %1084 }
0x15e9   :  { %v1087_v24 = vadd.f32 %v1085_v23, %v1077_v22 }
0x15eb   :  { %1856 = vtanh.f32 %v1087_v24 }
0x15f1   :  { %v1857_v25 = vpop.eup %1856 }
0x15f2   :  { %1090 = vrot.lane.b32.xlu0 %v1857_v25, %s2066_s25 }
0x1664   :  { %v1091_v26 = vpop.permute.xlu0 %1090 }
0x1665   :  { %v1093_v27 = vmul.f32 %v1091_v26, %v1074_v11  ;;  %v1705_v11 = vmul.f32 -1.442695, %v2383_v7 }
0x1667   :  { %1095 = vrot.lane.b32.xlu1 %v1093_v27, %s2067_s3 }
0x16d9   :  { %v1096_v28 = vpop.permute.xlu1 %1095 }
0x16da   :  { %1098 = vst.msk [vmem:[#allocation2 + $0x18] sm:$0xff] %vm201_vm5, %v1096_v28  ;;  %1721 = vmatmul.msk.f32.vlgmr.msra.gmra.mxu1 %vm201_vm5, %v1096_v28 }
0x1757   :  { %v1119_v31 = vpop.f32.mrf.mxu1 }
0x1758   :  { %v1122_v32 = vadd.f32 %v1119_v31, %v818_v30 }
0x175a   :  { %1858 = vtanh.f32 %v1122_v32  ;;  %v1722_v34 = vmul.f32 -1.442695, %v1122_v32 }
0x175c   :  { %1860 = vpow2.f32 %v1722_v34 }
0x1760   :  { %v1859_v33 = vpop.eup %1858 }
0x1761   :  { %1145 = vrot.lane.b32.xlu2 %v1859_v33, %s2066_s25 }
0x1762   :  { %v1861_v35 = vpop.eup %1860 }
0x1763   :  { %v1126_v36 = vadd.f32 1.0, %v1861_v35 }
0x1765   :  { %1862 = vrcp.f32 %v1126_v36  ;;  %v1138_v42 = vand.u32 2147483648, %v1126_v36  ;;  %vm1132_vm2 = vweird.f32 %v1126_v36  ;;  %v1136_v43 = vand.u32 2147483647, %v1126_v36 }
0x1767   :  { %v1139_v45 = vor.u32 1.1754944e-38, %v1138_v42  ;;  %vm1137_vm4 = vcmp.eq.f32.partialorder %v1136_v43, 8.507059e+37  ;;  %v1364_v42 = vld [vmem:[#allocation2 + $0x8] sm:$0xff]  ;;  %v1467_v43 = vld [vmem:[#allocation9 + $0x78] sm:$0xff] }
0x1768   :  { %1472 = vmatpush.msrb.mxu0 %v1467_v43 }
0x176b   :  { %v1863_v37 = vpop.eup %1862 }
0x176c   :  { %v1128_v38 = vmul.f32 %v1863_v37, %v1126_v36  ;;  %vm1133_vm1 = vweird.f32 %v1863_v37  ;;  %v1374_v36 = vld [vmem:[#allocation7 + $0x18] sm:$0xff] }
0x176d   :  { %vm1134_vm3 = vmor %vm1132_vm2, %vm1133_vm1  ;;  %1415 = vmatpush.msra.mxu1 %v1374_v36 }
0x176e   :  { %v1129_v39 = vsub.f32 1.0, %v1128_v38  ;;  %v1372_v38 = vld [vmem:[#allocation7 + $0x8] sm:$0xff] }
0x1770   :  { %v1130_v40 = vmul.f32 %v1863_v37, %v1129_v39  ;;  %v1371_v39 = vld [vmem:[#allocation7] sm:$0xff] }
0x1772   :  { %v1131_v41 = vadd.f32 %v1863_v37, %v1130_v40 }
0x1774   :  { %v1135_v44 = vsel %vm1134_vm3, %v1863_v37, %v1131_v41  ;;  %v1373_v37 = vld [vmem:[#allocation7 + $0x10] sm:$0xff]  ;;  %v1363_v41 = vld [vmem:[#allocation2] sm:$0xff] }
0x1775   :  { %v1140_v47 = vsel %vm1137_vm4, %v1139_v45, %v1135_v44  ;;  %1416 = vmatpush.msra.mxu1 %v1373_v37  ;;  %v1466_v44 = vld [vmem:[#allocation9 + $0x70] sm:$0xff]  ;;  %v1465_v45 = vld [vmem:[#allocation9 + $0x68] sm:$0xff] }
0x1776   :  { %v1143_v49 = vmul.f32 %v1140_v47, %v1087_v24  ;;  %1473 = vmatpush.msrb.mxu0 %v1466_v44 }
0x1777   :  { %1417 = vmatpush.msra.mxu1 %v1372_v38 }
0x1778   :  { %1474 = vmatpush.msrb.mxu0 %v1465_v45 }
0x1779   :  { %1418 = vmatpush.msra.mxu1 %v1371_v39 }
0x17bb   :  { %v1146_v46 = vpop.permute.xlu2 %1145 }
0x17bc   :  { %v1148_v48 = vmul.f32 %v1146_v46, %v1140_v47  ;;  %v1464_v46 = vld [vmem:[#allocation9 + $0x60] sm:$0xff] }
0x17bd   :  { %1475 = vmatpush.msrb.mxu0 %v1464_v46  ;;  %v1536_v46 = vld [vmem:[#allocation10 + $0x78] sm:$0xff] }
0x17be   :  { %1150 = vrot.lane.b32.xlu0 %v1148_v48, %s2067_s3  ;;  %v1365_v48 = vld [vmem:[#allocation2 + $0x10] sm:$0xff]  ;;  %1739 = vmatpush.msrb.mxu3 %v1536_v46 }
0x1830   :  { %v1151_v50 = vpop.permute.xlu0 %1150 }
0x1831   :  { %v1153_v51 = vadd.f32 %v1151_v50, %v1143_v49  ;;  %v1462_v49 = vld [vmem:[#allocation9 + $0x50] sm:$0xff]  ;;  %v1461_v50 = vld [vmem:[#allocation9 + $0x48] sm:$0xff] }
0x1833   :  { %1864 = vtanh.f32 %v1153_v51 }
0x1839   :  { %v1865_v53 = vpop.eup %1864 }
0x183a   :  { %1156 = vrot.lane.b32.xlu1 %v1865_v53, %s2066_s25  ;;  %v1459_v53 = vld [vmem:[#allocation9 + $0x38] sm:$0xff] }
0x18ac   :  { %v1157_v54 = vpop.permute.xlu1 %1156 }
0x18ad   :  { %v1159_v55 = vmul.f32 %v1157_v54, %v1140_v47  ;;  %v1463_v47 = vld [vmem:[#allocation9 + $0x58] sm:$0xff] }
0x18ae   :  { %1476 = vmatpush.msrb.mxu0 %v1463_v47  ;;  %v1366_v54 = vld [vmem:[#allocation2 + $0x18] sm:$0xff]  ;;  %v1535_v47 = vld [vmem:[#allocation10 + $0x70] sm:$0xff] }
0x18af   :  { %1161 = vrot.lane.b32.xlu2 %v1159_v55, %s2067_s3  ;;  %1740 = vmatpush.msrb.mxu3 %v1535_v47 }
0x18b0   :  { %1477 = vmatpush.msrb.mxu0 %v1462_v49  ;;  %v1533_v49 = vld [vmem:[#allocation10 + $0x60] sm:$0xff] }
0x18b2   :  { %1478 = vmatpush.msrb.mxu0 %v1461_v50 }
0x1909   :  { %v1162_v56 = vpop.permute.xlu2 %1161 }
0x190a   :  { %1164 = vst.msk [vmem:[#allocation2 + $0x20] sm:$0xff] %vm201_vm5, %v1162_v56  ;;  %1723 = vmatmul.msk.f32.vlgmr.msrb.gmra.mxu2 %vm201_vm5, %v1162_v56 }
0x190b   :  { %1541 = vmatpush.msrb.mxu2 %v1536_v46 }
0x190d   :  { %1542 = vmatpush.msrb.mxu2 %v1535_v47 }
0x1911   :  { %v1367_v55 = vld [vmem:[#allocation2 + $0x20] sm:$0xff] }
0x198d   :  { %v1185_v59 = vpop.f32.mrf.mxu2 }
0x198e   :  { %v1188_v60 = vadd.f32 %v1185_v59, %v821_v58  ;;  %v1457_v58 = vld [vmem:[#allocation9 + $0x28] sm:$0xff]  ;;  %v1456_v59 = vld [vmem:[#allocation9 + $0x20] sm:$0xff] }
0x1990   :  { %1866 = vtanh.f32 %v1188_v60  ;;  %v1724_v62 = vmul.f32 -1.442695, %v1188_v60  ;;  %v1455_v60 = vld [vmem:[#allocation9 + $0x18] sm:$0xff] }
0x1992   :  { %1868 = vpow2.f32 %v1724_v62  ;;  %v1453_v62 = vld [vmem:[#allocation9 + $0x8] sm:$0xff] }
0x1996   :  { %v1867_v61 = vpop.eup %1866 }
0x1997   :  { %1211 = vrot.lane.b32.xlu0 %v1867_v61, %s2066_s25  ;;  %v1454_v61 = vld [vmem:[#allocation9 + $0x10] sm:$0xff] }
0x1998   :  { %v1869_v63 = vpop.eup %1868 }
0x1999   :  { %v1192_v0 = vadd.f32 1.0, %v1869_v63  ;;  %v1452_v63 = vld [vmem:[#allocation9] sm:$0xff] }
0x199b   :  { %1870 = vrcp.f32 %v1192_v0  ;;  %v1204_v8 = vand.u32 2147483648, %v1192_v0  ;;  %vm1198_vm7 = vweird.f32 %v1192_v0  ;;  %v1202_v15 = vand.u32 2147483647, %v1192_v0 }
0x199c   :  { %1872 = vtanh.f32 %v2383_v7 }
0x199d   :  { %v1205_v2 = vor.u32 1.1754944e-38, %v1204_v8  ;;  %vm1203_vm9 = vcmp.eq.f32.partialorder %v1202_v15, 8.507059e+37  ;;  %v2450_v8 = vld [vmem:[%s2539_s8] ss:$0 sm:$0xff] }
0x19a1   :  { %v1871_v5 = vpop.eup %1870 }
0x19a2   :  { %v1194_v6 = vmul.f32 %v1871_v5, %v1192_v0  ;;  %vm1199_vm6 = vweird.f32 %v1871_v5  ;;  %v1873_v4 = vpop.eup %1872  ;;  %v823_v0 = vpop.f32.mrf.mxu3 }
0x19a3   :  { %vm1200_vm8 = vmor %vm1198_vm7, %vm1199_vm6 }
0x19a4   :  { %v1195_v10 = vsub.f32 1.0, %v1194_v6 }
0x19a6   :  { %v1196_v12 = vmul.f32 %v1871_v5, %v1195_v10 }
0x19a8   :  { %v1197_v13 = vadd.f32 %v1871_v5, %v1196_v12 }
0x19aa   :  { %v1201_v1 = vsel %vm1200_vm8, %v1871_v5, %v1197_v13  ;;  %v824_v5 = vadd.f32 %v2353_v14, %v823_v0  ;;  %v1521_v0 = vld [vmem:[#allocation10] sm:$0xff] }
0x19ab   :  { %v1206_v3 = vsel %vm1203_vm9, %v1205_v2, %v1201_v1 }
0x19ac   :  { %v1209_v18 = vmul.f32 %v1206_v3, %v1153_v51  ;;  %v1460_v51 = vld [vmem:[#allocation9 + $0x40] sm:$0xff] }
0x19ad   :  { %1479 = vmatpush.msrb.mxu0 %v1460_v51  ;;  %v1532_v51 = vld [vmem:[#allocation10 + $0x58] sm:$0xff] }
0x19af   :  { %1480 = vmatpush.msrb.mxu0 %v1459_v53  ;;  %v1531_v53 = vld [vmem:[#allocation10 + $0x50] sm:$0xff] }
0x19b1   :  { %1481 = vmatpush.msrb.mxu0 %v1458_v57  ;;  %v1527_v57 = vld [vmem:[#allocation10 + $0x30] sm:$0xff] }
0x19b3   :  { %1482 = vmatpush.msrb.mxu0 %v1457_v58  ;;  %v1526_v58 = vld [vmem:[#allocation10 + $0x28] sm:$0xff] }
0x19b5   :  { %1483 = vmatpush.msrb.mxu0 %v1456_v59  ;;  %v1525_v59 = vld [vmem:[#allocation10 + $0x20] sm:$0xff] }
0x19b7   :  { %1484 = vmatpush.msrb.mxu0 %v1455_v60  ;;  %v1524_v60 = vld [vmem:[#allocation10 + $0x18] sm:$0xff] }
0x19b9   :  { %1485 = vmatpush.msrb.mxu0 %v1454_v61  ;;  %v1523_v61 = vld [vmem:[#allocation10 + $0x10] sm:$0xff] }
0x19bb   :  { %1486 = vmatpush.msrb.mxu0 %v1453_v62 }
0x19bd   :  { %1487 = vmatpush.msrb.mxu0 %v1452_v63  ;;  %v1522_v63 = vld [vmem:[#allocation10 + $0x8] sm:$0xff] }
0x1a09   :  { %v1212_v16 = vpop.permute.xlu0 %1211 }
0x1a0a   :  { %v1214_v17 = vmul.f32 %v1212_v16, %v1206_v3 }
0x1a0c   :  { %1216 = vrot.lane.b32.xlu1 %v1214_v17, %s2067_s3 }
0x1a14   :  { %723 = vrot.lane.b32.xlu1 %v1873_v4, %s2066_s25 }
0x1a7e   :  { %v1217_v19 = vpop.permute.xlu1 %1216 }
0x1a7f   :  { %v2426_v20 = vadd.f32 %v1217_v19, %v1209_v18 }
0x1a81   :  { %1874 = vtanh.f32 %v2426_v20 }
0x1a82   :  { %1876 = vpow2.f32 %v1705_v11 }
0x1a86   :  { %v724_v33 = vpop.permute.xlu1 %723 }
0x1a87   :  { %v1875_v9 = vpop.eup %1874 }
0x1a88   :  { %1222 = vrot.lane.b32.xlu2 %v1875_v9, %s2066_s25  ;;  %v1877_v21 = vpop.eup %1876 }
0x1a89   :  { %v704_v22 = vadd.f32 1.0, %v1877_v21 }
0x1a8b   :  { %1878 = vrcp.f32 %v704_v22  ;;  %v716_v30 = vand.u32 2147483648, %v704_v22  ;;  %vm710_vm11 = vweird.f32 %v704_v22  ;;  %v714_v31 = vand.u32 2147483647, %v704_v22 }
0x1a8d   :  { %v717_v7 = vor.u32 1.1754944e-38, %v716_v30  ;;  %vm715_vm12 = vcmp.eq.f32.partialorder %v714_v31, 8.507059e+37 }
0x1a91   :  { %v1879_v23 = vpop.eup %1878 }
0x1a92   :  { %v706_v24 = vmul.f32 %v1879_v23, %v704_v22  ;;  %vm711_vm10 = vweird.f32 %v1879_v23 }
0x1a93   :  { %vm712_vm0 = vmor %vm710_vm11, %vm711_vm10 }
0x1a94   :  { %v707_v25 = vsub.f32 1.0, %v706_v24 }
0x1a96   :  { %v708_v26 = vmul.f32 %v1879_v23, %v707_v25 }
0x1a98   :  { %v709_v28 = vadd.f32 %v1879_v23, %v708_v26 }
0x1a9a   :  { %v713_v32 = vsel %vm712_vm0, %v1879_v23, %v709_v28 }
0x1a9b   :  { %v2432_v34 = vsel %vm715_vm12, %v717_v7, %v713_v32 }
0x1a9c   :  { %v726_v35 = vmul.f32 %v724_v33, %v2432_v34  ;;  %v721_v13 = vmul.f32 %v2432_v34, %v2361_v52 }
0x1ae2   :  { %v1223_v27 = vpop.permute.xlu2 %1222 }
0x1ae3   :  { %v1225_v29 = vmul.f32 %v1223_v27, %v1206_v3 }
0x1ae5   :  { %1227 = vrot.lane.b32.xlu0 %v1225_v29, %s2067_s3 }
0x1aed   :  { %728 = vrot.lane.b32.xlu0 %v726_v35, %s2067_s3 }
0x1b57   :  { %v1228_v40 = vpop.permute.xlu0 %1227 }
0x1b58   :  { %1230 = vst.msk [vmem:[#allocation2 + $0x28] sm:$0xff] %vm201_vm5, %v1228_v40  ;;  %1725 = vmatmul.msk.f32.vlgmr.msrb.gmra.mxu1 %vm201_vm5, %v1228_v40 }
0x1b5f   :  { %v1368_v56 = vld [vmem:[#allocation2 + $0x28] sm:$0xff]  ;;  %v729_v12 = vpop.permute.xlu0 %728 }
0x1b60   :  { %1729 = vmatmul.msk.f32.vlgmr.msra.gmra.mxu1 %vm201_vm5, %v1363_v41  ;;  %v731_v15 = vadd.f32 %v729_v12, %v721_v13 }
0x1b68   :  { %1730 = vmatmul.msk.f32.gmra.mxu1 %vm201_vm5, %v1364_v42 }
0x1b70   :  { %1731 = vmatmul.msk.f32.gmra.mxu1 %vm201_vm5, %v1365_v48  ;;  %v1534_v48 = vld [vmem:[#allocation10 + $0x68] sm:$0xff] }
0x1b71   :  { %1741 = vmatpush.msrb.mxu3 %v1534_v48  ;;  %1543 = vmatpush.msrb.mxu2 %v1534_v48 }
0x1b73   :  { %1742 = vmatpush.msrb.mxu3 %v1533_v49  ;;  %1544 = vmatpush.msrb.mxu2 %v1533_v49 }
0x1b75   :  { %1743 = vmatpush.msrb.mxu3 %v1532_v51  ;;  %1545 = vmatpush.msrb.mxu2 %v1532_v51 }
0x1b77   :  { %1744 = vmatpush.msrb.mxu3 %v1531_v53  ;;  %1546 = vmatpush.msrb.mxu2 %v1531_v53 }
0x1b78   :  { %1732 = vmatmul.msk.f32.gmra.mxu1 %vm201_vm5, %v1366_v54  ;;  %v1529_v54 = vld [vmem:[#allocation10 + $0x40] sm:$0xff] }
0x1b80   :  { %1733 = vmatmul.msk.f32.gmra.mxu1 %vm201_vm5, %v1367_v55 }
0x1b88   :  { %1734 = vmatmul.msk.f32.gmra.mxu1 %vm201_vm5, %v1368_v56  ;;  %v1528_v56 = vld [vmem:[#allocation10 + $0x38] sm:$0xff] }
0x1bd5   :  { %v1251_v6 = vpop.f32.mrf.mxu1 }
0x1bd6   :  { %v1254_v10 = vadd.f32 %v1251_v6, %v824_v5 }
0x1bd8   :  { %1880 = vtanh.f32 %v1254_v10  ;;  %v1726_v29 = vmul.f32 -1.442695, %v1254_v10 }
0x1bd9   :  { %1882 = vtanh.f32 %v731_v15 }
0x1bda   :  { %1884 = vpow2.f32 %v1726_v29  ;;  %v1930_v29 = vld [vmem:[%s2537_s6] ss:$0 sm:$0xff] }
0x1bdd   :  { %v1420_v1 = vpop.f32.mrf.mxu1 }
0x1bde   :  { %v1881_v2 = vpop.eup %1880  ;;  %v1421_v16 = vadd.f32 %v2450_v8, %v1420_v1 }
0x1bdf   :  { %1277 = vrot.lane.b32.xlu2 %v1881_v2, %s2066_s25  ;;  %v1883_v17 = vpop.eup %1882 }
0x1be0   :  { %v1444_v14 = vmax.f32 %v1421_v16, 0.0  ;;  %v1885_v30 = vpop.eup %1884 }
0x1be1   :  { %v1258_v31 = vadd.f32 1.0, %v1885_v30 }
0x1be2   :  { %1488 = vmatmul.f32.vlgmr.msrb.gmra.mxu0 %v1444_v14  ;;  %v2476_v14 = vld [vmem:[%s2541_s10] ss:$0 sm:$0xff] }
0x1be3   :  { %1886 = vrcp.f32 %v1258_v31  ;;  %v1270_v37 = vand.u32 2147483648, %v1258_v31  ;;  %vm1264_vm14 = vweird.f32 %v1258_v31  ;;  %v1268_v38 = vand.u32 2147483647, %v1258_v31 }
0x1be5   :  { %v1423_v3 = vpop.f32.mrf.mxu1  ;;  %v1271_v40 = vor.u32 1.1754944e-38, %v1270_v37  ;;  %vm1269_vm1 = vcmp.eq.f32.partialorder %v1268_v38, 8.507059e+37 }
0x1be6   :  { %v1424_v4 = vadd.f32 %v2450_v8, %v1423_v3 }
0x1be7   :  { %734 = vrot.lane.b32.xlu2 %v1883_v17, %s2066_s25 }
0x1be8   :  { %v1445_v52 = vmax.f32 %v1424_v4, 0.0 }
0x1be9   :  { %v1887_v32 = vpop.eup %1886 }
0x1bea   :  { %1491 = vmatmul.f32.gmra.mxu0 %v1445_v52  ;;  %v1260_v7 = vmul.f32 %v1887_v32, %v1258_v31  ;;  %vm1265_vm13 = vweird.f32 %v1887_v32 }
0x1beb   :  { %vm1266_vm15 = vmor %vm1264_vm14, %vm1265_vm13 }
0x1bec   :  { %v1261_v33 = vsub.f32 1.0, %v1260_v7 }
0x1bed   :  { %v1426_v18 = vpop.f32.mrf.mxu1 }
0x1bee   :  { %v1427_v19 = vadd.f32 %v2450_v8, %v1426_v18  ;;  %v1262_v35 = vmul.f32 %v1887_v32, %v1261_v33 }
0x1bf0   :  { %v1446_v9 = vmax.f32 %v1427_v19, 0.0  ;;  %v1263_v36 = vadd.f32 %v1887_v32, %v1262_v35 }
0x1bf2   :  { %1494 = vmatmul.f32.gmra.mxu0 %v1446_v9  ;;  %v1267_v39 = vsel %vm1266_vm15, %v1887_v32, %v1263_v36 }
0x1bf3   :  { %v2460_v42 = vsel %vm1269_vm1, %v1271_v40, %v1267_v39 }
0x1bf4   :  { %v1275_v6 = vmul.f32 %v2460_v42, %v2426_v20 }
0x1bf5   :  { %v1429_v11 = vpop.f32.mrf.mxu1 }
0x1bf6   :  { %v1430_v21 = vadd.f32 %v2450_v8, %v1429_v11 }
0x1bf8   :  { %v1447_v22 = vmax.f32 %v1430_v21, 0.0 }
0x1bfa   :  { %1497 = vmatmul.f32.gmra.mxu0 %v1447_v22 }
0x1bfd   :  { %v1432_v23 = vpop.f32.mrf.mxu1 }
0x1bfe   :  { %v1433_v24 = vadd.f32 %v2450_v8, %v1432_v23 }
0x1c00   :  { %v1448_v25 = vmax.f32 %v1433_v24, 0.0 }
0x1c02   :  { %1500 = vmatmul.f32.gmra.mxu0 %v1448_v25 }
0x1c05   :  { %v1435_v26 = vpop.f32.mrf.mxu1 }
0x1c06   :  { %v1436_v27 = vadd.f32 %v2450_v8, %v1435_v26 }
0x1c08   :  { %v1449_v28 = vmax.f32 %v1436_v27, 0.0 }
0x1c0a   :  { %1503 = vmatmul.f32.gmra.mxu0 %v1449_v28 }
0x1c39   :  { %v1278_v41 = vpop.permute.xlu2 %1277 }
0x1c3a   :  { %v1280_v43 = vmul.f32 %v1278_v41, %v2460_v42 }
0x1c3c   :  { %1282 = vrot.lane.b32.xlu1 %v1280_v43, %s2067_s3 }
0x1c41   :  { %v735_v44 = vpop.permute.xlu2 %734 }
0x1c42   :  { %v737_v45 = vmul.f32 %v735_v44, %v2432_v34  ;;  %v1530_v34 = vld [vmem:[#allocation10 + $0x48] sm:$0xff] }
0x1c43   :  { %1745 = vmatpush.msrb.mxu3 %v1530_v34  ;;  %1547 = vmatpush.msrb.mxu2 %v1530_v34 }
0x1c44   :  { %739 = vrot.lane.b32.xlu1 %v737_v45, %s2067_s3 }
0x1c45   :  { %1746 = vmatpush.msrb.mxu3 %v1529_v54  ;;  %1548 = vmatpush.msrb.mxu2 %v1529_v54 }
0x1c47   :  { %1747 = vmatpush.msrb.mxu3 %v1528_v56  ;;  %1549 = vmatpush.msrb.mxu2 %v1528_v56 }
0x1c49   :  { %1748 = vmatpush.msrb.mxu3 %v1527_v57  ;;  %1550 = vmatpush.msrb.mxu2 %v1527_v57 }
0x1c4b   :  { %1749 = vmatpush.msrb.mxu3 %v1526_v58  ;;  %1551 = vmatpush.msrb.mxu2 %v1526_v58 }
0x1c4d   :  { %1750 = vmatpush.msrb.mxu3 %v1525_v59  ;;  %1552 = vmatpush.msrb.mxu2 %v1525_v59  ;;  %v2500_v59 = vld [vmem:[%s2543_s12] ss:$0 sm:$0xff]  ;;  %s2068_s12 = smov [#allocation12]  }
0x1c4f   :  { %1751 = vmatpush.msrb.mxu3 %v1524_v60  ;;  %1553 = vmatpush.msrb.mxu2 %v1524_v60 }
0x1c51   :  { %1752 = vmatpush.msrb.mxu3 %v1523_v61  ;;  %1554 = vmatpush.msrb.mxu2 %v1523_v61 }
0x1c53   :  { %1753 = vmatpush.msrb.mxu3 %v1522_v63  ;;  %1555 = vmatpush.msrb.mxu2 %v1522_v63 }
0x1c55   :  { %1754 = vmatpush.msrb.mxu3 %v1521_v0  ;;  %1556 = vmatpush.msrb.mxu2 %v1521_v0 }
0x1c5f   :  { %v1489_v50 = vpop.f32.mrf.mxu0 }
0x1c60   :  { %v1490_v18 = vadd.f32 %v2476_v14, %v1489_v50 }
0x1c62   :  { %v1513_v19 = vmax.f32 %v1490_v18, 0.0 }
0x1c67   :  { %v1492_v55 = vpop.f32.mrf.mxu0 }
0x1c68   :  { %v1493_v11 = vadd.f32 %v2476_v14, %v1492_v55 }
0x1c6a   :  { %v1514_v21 = vmax.f32 %v1493_v11, 0.0 }
0x1c6f   :  { %v1495_v62 = vpop.f32.mrf.mxu0 }
0x1c70   :  { %v1496_v22 = vadd.f32 %v2476_v14, %v1495_v62 }
0x1c72   :  { %v1515_v23 = vmax.f32 %v1496_v22, 0.0 }
0x1c77   :  { %v1498_v5 = vpop.f32.mrf.mxu0 }
0x1c78   :  { %v1499_v24 = vadd.f32 %v2476_v14, %v1498_v5 }
0x1c7a   :  { %v1516_v25 = vmax.f32 %v1499_v24, 0.0 }
0x1c7f   :  { %v1501_v13 = vpop.f32.mrf.mxu0 }
0x1c80   :  { %v1502_v26 = vadd.f32 %v2476_v14, %v1501_v13 }
0x1c82   :  { %v1517_v27 = vmax.f32 %v1502_v26, 0.0 }
0x1c87   :  { %v1504_v2 = vpop.f32.mrf.mxu0 }
0x1c88   :  { %v1505_v20 = vadd.f32 %v2476_v14, %v1504_v2 }
0x1c8a   :  { %v1518_v3 = vmax.f32 %v1505_v20, 0.0 }
0x1cae   :  { %v1283_v10 = vpop.permute.xlu1 %1282 }
0x1caf   :  { %v2468_v12 = vadd.f32 %v1283_v10, %v1275_v6 }
0x1cb1   :  { %1888 = vtanh.f32 %v2468_v12 }
0x1cb6   :  { %v740_v15 = vpop.permute.xlu1 %739 }
0x1cb7   :  { %v1889_v1 = vpop.eup %1888  ;;  %743 = vst.msk [vmem:[#allocation2 + $0x38] sm:$0xff] %vm201_vm5, %v740_v15 }
0x1cb8   :  { %1288 = vrot.lane.b32.xlu0 %v1889_v1, %s2066_s25 }
0x1cbe   :  { %v760_v16 = vld [vmem:[#allocation2 + $0x38] sm:$0xff] }
0x1cbf   :  { %1713 = vmatmul.msk.f32.gmra.mxu3 %vm201_vm5, %v760_v16 }
0x1cc7   :  { %1572 = vmatmul.f32.vlgmr.msrb.gmra.mxu3 %v1518_v3 }
0x1d2a   :  { %v1289_v17 = vpop.permute.xlu0 %1288 }
0x1d2b   :  { %v1291_v4 = vmul.f32 %v1289_v17, %v2460_v42 }
0x1d2d   :  { %1293 = vrot.lane.b32.xlu2 %v1291_v4, %s2067_s3 }
0x1d42   :  { %v826_v28 = vpop.f32.mrf.mxu3 }
0x1d43   :  { %v827_v30 = vadd.f32 %v1930_v29, %v826_v28 }
0x1d4a   :  { %v1573_v2 = vpop.f32.mrf.mxu3 }
0x1d4b   :  { %v2509_v20 = vadd.f32 %v2500_v59, %v1573_v2 }
0x1d87   :  { %v1294_v52 = vpop.permute.xlu2 %1293 }
0x1d88   :  { %1296 = vst.msk [vmem:[#allocation2 + $0x30] sm:$0xff] %vm201_vm5, %v1294_v52  ;;  %1727 = vmatmul.msk.f32.vlgmr.msra.gmra.mxu2 %vm201_vm5, %v1294_v52 }
0x1d8f   :  { %v1369_v9 = vld [vmem:[#allocation2 + $0x30] sm:$0xff] }
0x1d90   :  { %1735 = vmatmul.msk.f32.gmra.mxu1 %vm201_vm5, %v1369_v9  ;;  %1557 = vmatmul.f32.vlgmr.msrb.gmra.mxu2 %v1513_v19 }
0x1d98   :  { %1560 = vmatmul.f32.gmra.mxu2 %v1514_v21 }
0x1da0   :  { %1563 = vmatmul.f32.gmra.mxu2 %v1515_v23 }
0x1da8   :  { %1566 = vmatmul.f32.gmra.mxu2 %v1516_v25 }
0x1db0   :  { %1569 = vmatmul.f32.gmra.mxu2 %v1517_v27 }
0x1e0b   :  { %v1317_v31 = vpop.f32.mrf.mxu2 }
0x1e0c   :  { %v1320_v32 = vadd.f32 %v1317_v31, %v827_v30 }
0x1e0d   :  { %v1438_v7 = vpop.f32.mrf.mxu1 }
0x1e0e   :  { %1890 = vtanh.f32 %v1320_v32  ;;  %v1439_v33 = vadd.f32 %v2450_v8, %v1438_v7  ;;  %v1728_v37 = vmul.f32 -1.442695, %v1320_v32 }
0x1e10   :  { %v1450_v35 = vmax.f32 %v1439_v33, 0.0  ;;  %1892 = vpow2.f32 %v1728_v37 }
0x1e12   :  { %1506 = vmatmul.f32.gmra.mxu0 %v1450_v35 }
0x1e13   :  { %v1558_v53 = vpop.f32.mrf.mxu2 }
0x1e14   :  { %v1891_v36 = vpop.eup %1890  ;;  %v1559_v60 = vadd.f32 %v2500_v59, %v1558_v53 }
0x1e15   :  { %1343 = vrot.lane.b32.xlu0 %v1891_v36, %s2066_s25 }
0x1e16   :  { %v1893_v38 = vpop.eup %1892 }
0x1e17   :  { %v1324_v39 = vadd.f32 1.0, %v1893_v38 }
0x1e19   :  { %1894 = vrcp.f32 %v1324_v39  ;;  %v1336_v45 = vand.u32 2147483648, %v1324_v39  ;;  %vm1330_vm3 = vweird.f32 %v1324_v39  ;;  %v1334_v46 = vand.u32 2147483647, %v1324_v39 }
0x1e1b   :  { %v1337_v48 = vor.u32 1.1754944e-38, %v1336_v45  ;;  %vm1335_vm6 = vcmp.eq.f32.partialorder %v1334_v46, 8.507059e+37  ;;  %v1561_v56 = vpop.f32.mrf.mxu2 }
0x1e1c   :  { %v1562_v10 = vadd.f32 %v2500_v59, %v1561_v56 }
0x1e1f   :  { %v1895_v40 = vpop.eup %1894 }
0x1e20   :  { %v1326_v41 = vmul.f32 %v1895_v40, %v1324_v39  ;;  %vm1331_vm2 = vweird.f32 %v1895_v40 }
0x1e21   :  { %vm1332_vm4 = vmor %vm1330_vm3, %vm1331_vm2 }
0x1e22   :  { %v1327_v42 = vsub.f32 1.0, %v1326_v41 }
0x1e23   :  { %v1564_v57 = vpop.f32.mrf.mxu2 }
0x1e24   :  { %v1328_v43 = vmul.f32 %v1895_v40, %v1327_v42  ;;  %v2514_v4 = vadd.f32 %v2500_v59, %v1564_v57 }
0x1e26   :  { %v1329_v44 = vadd.f32 %v1895_v40, %v1328_v43 }
0x1e28   :  { %v1333_v47 = vsel %vm1332_vm4, %v1895_v40, %v1329_v44 }
0x1e29   :  { %v1338_v50 = vsel %vm1335_vm6, %v1337_v48, %v1333_v47 }
0x1e2a   :  { %v1341_v63 = vmul.f32 %v1338_v50, %v2468_v12 }
0x1e2b   :  { %v1567_v58 = vpop.f32.mrf.mxu2 }
0x1e2c   :  { %v1568_v13 = vadd.f32 %v2500_v59, %v1567_v58 }
0x1e33   :  { %v1570_v61 = vpop.f32.mrf.mxu2 }
0x1e34   :  { %v1571_v62 = vadd.f32 %v2500_v59, %v1570_v61 }
0x1e87   :  { %v1344_v49 = vpop.permute.xlu0 %1343 }
0x1e88   :  { %v1346_v51 = vmul.f32 %v1344_v49, %v1338_v50 }
0x1e8a   :  { %1348 = vrot.lane.b32.xlu1 %v1346_v51, %s2067_s3 }
0x1e8f   :  { %v1507_v34 = vpop.f32.mrf.mxu0 }
0x1e90   :  { %v1508_v54 = vadd.f32 %v2476_v14, %v1507_v34 }
0x1e92   :  { %v1519_v55 = vmax.f32 %v1508_v54, 0.0 }
0x1e94   :  { %1575 = vmatmul.f32.gmra.mxu3 %v1519_v55 }
0x1eb4   :  { %1582 = vmax.xlane.f32.xlu1 %v1559_v60 }
0x1ebc   :  { %1590 = vmax.xlane.f32.xlu1 %v1571_v62 }
0x1efc   :  { %v1349_v0 = vpop.permute.xlu1 %1348 }
0x1efd   :  { %v1351_v5 = vadd.f32 %v1349_v0, %v1341_v63 }
0x1eff   :  { %1896 = vtanh.f32 %v1351_v5 }
0x1f05   :  { %v1897_v6 = vpop.eup %1896 }
0x1f06   :  { %1354 = vrot.lane.b32.xlu2 %v1897_v6, %s2066_s25  ;;  %s1666_s25 = sshll.u32 %s2068_s12, 4  ;;  %s1667_s25 = int_to_ptr.vmem [resolvable:$true] %s1666_s25 }
0x1f17   :  { %v1576_v52 = vpop.f32.mrf.mxu3 }
0x1f18   :  { %v1577_v18 = vadd.f32 %v2500_v59, %v1576_v52 }
0x1f27   :  { %v1583_v15 = vpop.xlane.xlu1 %1582 }
0x1f28   :  { %v1598_v1 = vsub.f32 %v1559_v60, %v1583_v15 }
0x1f2a   :  { %v1606_v16 = vmul.f32 1.442695, %v1598_v1 }
0x1f2c   :  { %1898 = vpow2.f32 %v1606_v16 }
0x1f2f   :  { %1584 = vmax.xlane.f32.xlu2 %v1562_v10  ;;  %v1591_v9 = vpop.xlane.xlu1 %1590 }
0x1f30   :  { %v1602_v22 = vsub.f32 %v1571_v62, %v1591_v9 }
0x1f32   :  { %v1899_v12 = vpop.eup %1898  ;;  %v1614_v23 = vmul.f32 1.442695, %v1602_v22 }
0x1f37   :  { %1588 = vmax.xlane.f32.xlu2 %v1568_v13 }
0x1f3f   :  { %1592 = vmax.xlane.f32.xlu2 %v2509_v20 }
0x1f47   :  { %1622 = vadd.xlane.f32.xlu2 %v1899_v12 }
0x1f60   :  { %v1355_v3 = vpop.permute.xlu2 %1354 }
0x1f61   :  { %v1357_v17 = vmul.f32 %v1355_v3, %v1338_v50 }
0x1f63   :  { %1359 = vrot.lane.b32.xlu0 %v1357_v17, %s2067_s3 }
0x1f8d   :  { %1586 = vmax.xlane.f32.xlu0 %v2514_v4 }
0x1f95   :  { %1594 = vmax.xlane.f32.xlu0 %v1577_v18 }
0x1fa2   :  { %v1585_v19 = vpop.xlane.xlu2 %1584 }
0x1fa3   :  { %v1599_v11 = vsub.f32 %v1562_v10, %v1585_v19 }
0x1fa5   :  { %v1608_v21 = vmul.f32 1.442695, %v1599_v11 }
0x1fa7   :  { %1900 = vpow2.f32 %v1608_v21 }
0x1fa8   :  { %1902 = vpow2.f32 %v1614_v23 }
0x1faa   :  { %v1589_v24 = vpop.xlane.xlu2 %1588 }
0x1fab   :  { %v1601_v25 = vsub.f32 %v1568_v13, %v1589_v24 }
0x1fad   :  { %v1901_v26 = vpop.eup %1900  ;;  %v1612_v27 = vmul.f32 1.442695, %v1601_v25 }
0x1fae   :  { %1624 = vadd.xlane.f32.xlu0 %v1901_v26  ;;  %v1903_v29 = vpop.eup %1902 }
0x1faf   :  { %1904 = vpow2.f32 %v1612_v27 }
0x1fb2   :  { %v1593_v28 = vpop.xlane.xlu2 %1592 }
0x1fb5   :  { %v1905_v30 = vpop.eup %1904 }
0x1fb6   :  { %1628 = vadd.xlane.f32.xlu2 %v1905_v30  ;;  %1630 = vadd.xlane.f32.xlu0 %v1903_v29 }
0x1fba   :  { %v1623_v31 = vpop.xlane.xlu2 %1622 }
0x1fbb   :  { %1906 = vrcp.f32 %v1623_v31 }
0x1fc1   :  { %v1907_v32 = vpop.eup %1906 }
0x1fc2   :  { %v1646_v7 = vmul.f32 %v1907_v32, %v1899_v12 }
0x1fc4   :  { %1654 = vst [vmem:[#allocation12] sm:$0xff] %v1646_v7 }
0x1fd5   :  { %v1360_v33 = vpop.permute.xlu0 %1359 }
0x1fd6   :  { %1362 = vst.msk [vmem:[#allocation2 + $0x38] sm:$0xff] %vm201_vm5, %v1360_v33 }
0x1fdd   :  { %v1370_v35 = vld [vmem:[#allocation2 + $0x38] sm:$0xff] }
0x1fde   :  { %1736 = vmatmul.msk.f32.gmra.mxu1 %vm201_vm5, %v1370_v35 }
0x2000   :  { %v1587_v36 = vpop.xlane.xlu0 %1586 }
0x2001   :  { %v1600_v60 = vsub.f32 %v2514_v4, %v1587_v36 }
0x2003   :  { %v1610_v61 = vmul.f32 1.442695, %v1600_v60 }
0x2008   :  { %v1595_v37 = vpop.xlane.xlu0 %1594 }
0x2009   :  { %v1604_v38 = vsub.f32 %v1577_v18, %v1595_v37 }
0x200b   :  { %v1618_v39 = vmul.f32 1.442695, %v1604_v38 }
0x200d   :  { %1908 = vpow2.f32 %v1618_v39 }
0x2013   :  { %v1909_v40 = vpop.eup %1908 }
0x2014   :  { %1634 = vadd.xlane.f32.xlu2 %v1909_v40 }
0x2021   :  { %v1625_v41 = vpop.xlane.xlu0 %1624 }
0x2022   :  { %1910 = vrcp.f32 %v1625_v41 }
0x2028   :  { %v1911_v42 = vpop.eup %1910 }
0x2029   :  { %v1647_v43 = vmul.f32 %v1911_v42, %v1901_v26  ;;  %v1629_v44 = vpop.xlane.xlu2 %1628  ;;  %v1631_v45 = vpop.xlane.xlu0 %1630 }
0x202a   :  { %1912 = vrcp.f32 %v1629_v44 }
0x202b   :  { %1655 = vst [vmem:[#allocation12 + $0x8] sm:$0xff] %v1647_v43  ;;  %1914 = vrcp.f32 %v1631_v45 }
0x2030   :  { %v1913_v46 = vpop.eup %1912 }
0x2031   :  { %v1915_v47 = vpop.eup %1914  ;;  %v1649_v48 = vmul.f32 %v1913_v46, %v1905_v30 }
0x2032   :  { %v1650_v49 = vmul.f32 %v1915_v47, %v1903_v29 }
0x2033   :  { %1657 = vst [vmem:[#allocation12 + $0x18] sm:$0xff] %v1649_v48 }
0x2034   :  { %1658 = vst [vmem:[#allocation12 + $0x20] sm:$0xff] %v1650_v49 }
0x205b   :  { %v1441_v50 = vpop.f32.mrf.mxu1 }
0x205c   :  { %v1442_v51 = vadd.f32 %v2450_v8, %v1441_v50  ;;  %v1603_v8 = vsub.f32 %v2509_v20, %v1593_v28 }
0x205e   :  { %v1451_v53 = vmax.f32 %v1442_v51, 0.0  ;;  %v1616_v0 = vmul.f32 1.442695, %v1603_v8 }
0x2060   :  { %1509 = vmatmul.f32.gmra.mxu0 %v1451_v53 }
0x2087   :  { %v1635_v34 = vpop.xlane.xlu2 %1634 }
0x2088   :  { %1916 = vrcp.f32 %v1635_v34 }
0x2089   :  { %1918 = vpow2.f32 %v1610_v61 }
0x208a   :  { %1920 = vpow2.f32 %v1616_v0 }
0x208e   :  { %v1917_v54 = vpop.eup %1916 }
0x208f   :  { %v1652_v55 = vmul.f32 %v1917_v54, %v1909_v40  ;;  %v1919_v5 = vpop.eup %1918 }
0x2090   :  { %v1921_v6 = vpop.eup %1920 }
0x2091   :  { %1660 = vst [vmem:[#allocation12 + $0x30] sm:$0xff] %v1652_v55 }
0x20dd   :  { %v1510_v56 = vpop.f32.mrf.mxu0 }
0x20de   :  { %v1511_v57 = vadd.f32 %v2476_v14, %v1510_v56 }
0x20e0   :  { %v1520_v58 = vmax.f32 %v1511_v57, 0.0 }
0x20e2   :  { %1578 = vmatmul.f32.gmra.mxu3 %v1520_v58 }
0x2165   :  { %v1579_v62 = vpop.f32.mrf.mxu3 }
0x2166   :  { %v1580_v63 = vadd.f32 %v2500_v59, %v1579_v62 }
0x2168   :  { %1596 = vmax.xlane.f32.xlu1 %v1580_v63 }
0x2170   :  { %1626 = vadd.xlane.f32.xlu1 %v1919_v5 }
0x2178   :  { %1632 = vadd.xlane.f32.xlu1 %v1921_v6 }
0x21db   :  { %v1597_v10 = vpop.xlane.xlu1 %1596 }
0x21dc   :  { %v1605_v14 = vsub.f32 %v1580_v63, %v1597_v10 }
0x21de   :  { %v1620_v13 = vmul.f32 1.442695, %v1605_v14 }
0x21e0   :  { %1922 = vpow2.f32 %v1620_v13 }
0x21e3   :  { %v1627_v15 = vpop.xlane.xlu1 %1626 }
0x21e4   :  { %1924 = vrcp.f32 %v1627_v15 }
0x21e6   :  { %v1923_v1 = vpop.eup %1922 }
0x21e7   :  { %1636 = vadd.xlane.f32.xlu0 %v1923_v1 }
0x21ea   :  { %v1925_v2 = vpop.eup %1924 }
0x21eb   :  { %v1648_v59 = vmul.f32 %v1925_v2, %v1919_v5  ;;  %v1633_v16 = vpop.xlane.xlu1 %1632 }
0x21ec   :  { %1926 = vrcp.f32 %v1633_v16 }
0x21ed   :  { %1656 = vst [vmem:[#allocation12 + $0x10] sm:$0xff] %v1648_v59 }
0x21f2   :  { %v1927_v20 = vpop.eup %1926 }
0x21f3   :  { %v1651_v12 = vmul.f32 %v1927_v20, %v1921_v6 }
0x21f5   :  { %1659 = vst [vmem:[#allocation12 + $0x28] sm:$0xff] %v1651_v12 }
0x225a   :  { %v1637_v3 = vpop.xlane.xlu0 %1636 }
0x225b   :  { %1928 = vrcp.f32 %v1637_v3 }
0x2261   :  { %v1929_v17 = vpop.eup %1928 }
0x2262   :  { %v1653_v4 = vmul.f32 %v1929_v17, %v1923_v1 }
0x2264   :  { %1661 = vst [vmem:[#allocation12 + $0x38] sm:$0xff] %v1653_v4 }
0x2265   :  { %1674 = dma.vmem_to_hbm [thread:$0]  %s1667_s25, 1024, %s1669_s30, [#allocation6], %s2060_s16, %s2060_s16, %s2061_s17  }
0x2266   :  { %2057 = dma.done.wait [#allocation6], 1024  }
0x2267   :  { %2058 = vsyncadd [#allocation6], 4294966272 }
0x2268   :  { %1679 = vsyncpa [#allocation5], 1 }
0x2269   :  { %1680 = vsyncpa [#allocation8], 1 }
0x226a   :  { %1681 = vsyncpa [#allocation11], 1 }
0x226b   :  { %1682 = vsyncpa [#allocation6], 1 }

</bundles_post_ra>
